<compile_context>
chip_gen: v6e
topology: v6e:2x2x1
jax: 0.10.0
libtpu: 0.0.40
codegen_flags: <defaults>
</compile_context>

<pallas_src>
import functools

import jax
import jax.numpy as jnp
from jax.experimental import pallas as pl
from jax.experimental.pallas import tpu as pltpu


# ---------------------------------------------------------------------------
# Fused Pallas kernel: the entire InceptionResNetA block, B images per step.
# ---------------------------------------------------------------------------
def _inception_resnet_a_kernel(
    x_ref,                       # (B, Cin, HW)   NCHW-native input images
    masks_ref,                   # (4, HW)        [row>0, row<H-1, col>0, col<W-1]
    ws_ref, bs_ref,              # (P, Cin), (P, 1)             fused stem 1x1
    w3_ref, b3_ref,              # (9, c3_1, c3_0), (c3_1, 1)   branch-3x3 conv
    wd1_ref, bd1_ref,            # (9, cd_1, cd_0), (cd_1, 1)   branch-3x3db conv1
    wd2_ref, bd2_ref,            # (9, cd_2, cd_1), (cd_2, 1)   branch-3x3db conv2
    wm1_ref, wm3_ref, wmd_ref,   # (Cin, p1), (Cin, c3_1), (Cin, cd_2)  merge 1x1
    bm_ref,                      # (Cin, 1)
    o_ref,                       # (B, Cin, HW)   output
    *, W, p1, p3_0,
):
    B = x_ref.shape[0]
    HW = x_ref.shape[2]

    # ---- boundary masks, combined per tap; shared by all convs & images ----
    masks = masks_ref[...]                         # (4, HW) f32
    mv = {-1: masks[0:1, :], 0: None, 1: masks[1:2, :]}
    mh = {-1: masks[2:3, :], 0: None, 1: masks[3:4, :]}
    tap_mask = {}
    for dy in (-1, 0, 1):
        for dx in (-1, 0, 1):
            m = mv[dy]
            if mh[dx] is not None:
                m = mh[dx] if m is None else m * mh[dx]
            tap_mask[(dy, dx)] = m

    # ---- weights: load once per grid step, reused by all B images ---------
    w_s, b_s = ws_ref[...], bs_ref[...]
    w3, b3 = w3_ref[...], b3_ref[...]
    wd1, bd1 = wd1_ref[...], bd1_ref[...]
    wd2, bd2 = wd2_ref[...], bd2_ref[...]
    wm1, wm3, wmd, b_m = wm1_ref[...], wm3_ref[...], wmd_ref[...], bm_ref[...]

    def conv3x3(xin, w9, bias):
        """3x3 conv (pad=1, stride=1) + folded BN + ReLU, taps via lane rolls.

        pltpu.roll follows jnp.roll: roll(x, s)[:, p] = x[:, (p - s) % HW], so
        shift (-d) % HW gives tap[:, p] = x[:, (p + d) % HW]; output pixels
        whose neighbour p + d falls outside the image are zeroed by the mask.
        """
        cout = w9.shape[1]
        acc = jnp.zeros((cout, HW), jnp.float32)
        t = 0
        for dy in (-1, 0, 1):
            for dx in (-1, 0, 1):
                d = dy * W + dx
                tap = xin if d == 0 else pltpu.roll(xin, (-d) % HW, 1)
                m = tap_mask[(dy, dx)]
                if m is not None:
                    tap = tap * m
                acc = acc + jnp.dot(w9[t], tap,
                                    preferred_element_type=jnp.float32)
                t += 1
        return jnp.maximum(acc + bias, 0.0)

    # ---- B images per step; unrolled so the scheduler can interleave the
    # independent images' MXU / VPU / XLU work --------------------------------
    for b in range(B):
        x = x_ref[b]                               # (Cin, HW)
        # fused stem: the three 1x1 conv blocks that all consume x
        stem = jnp.maximum(
            jnp.dot(w_s, x, preferred_element_type=jnp.float32) + b_s, 0.0)
        y1 = stem[0:p1]                            # branch-1x1 output
        y3 = conv3x3(stem[p1:p1 + p3_0], w3, b3)   # branch-3x3
        yd = conv3x3(stem[p1 + p3_0:], wd1, bd1)   # branch-3x3db
        yd = conv3x3(yd, wd2, bd2)
        # merge 1x1 block on the (virtual) channel concat
        r = (jnp.dot(wm1, y1, preferred_element_type=jnp.float32)
             + jnp.dot(wm3, y3, preferred_element_type=jnp.float32)
             + jnp.dot(wmd, yd, preferred_element_type=jnp.float32)
             + b_m)
        r = jnp.maximum(r, 0.0)                    # Conv2d1x1Block activation
        o_ref[b] = jnp.maximum(x + r, 0.0).astype(o_ref.dtype)


# ---------------------------------------------------------------------------
# Parameter construction: Conv2d(bias=False)+BatchNorm2d(eval) folded weights,
# already stored in the (Cout, Cin) orientation the kernel wants.
# ---------------------------------------------------------------------------
def _fold_bn(key, kh, kw, cin, cout, eps=1e-5):
    k1, k2, k3, k4, k5 = jax.random.split(key, 5)
    w = 0.1 * jax.random.normal(k1, (kh, kw, cin, cout), jnp.float32)   # HWIO
    gamma = 1.0 + 0.1 * jax.random.normal(k2, (cout,), jnp.float32)
    beta = 0.1 * jax.random.normal(k3, (cout,), jnp.float32)
    r_mean = 0.1 * jax.random.normal(k4, (cout,), jnp.float32)
    r_var = 1.0 + jnp.abs(jax.random.normal(k5, (cout,), jnp.float32))
    scale = gamma / jnp.sqrt(r_var + eps)
    return w * scale, beta - r_mean * scale        # (kh,kw,cin,cout), (cout,)


def init_inception_resnet_a(key, inp, planes_1x1, planes_3x3, planes_3x3db):
    ks = jax.random.split(key, 7)
    w_b1, b_b1 = _fold_bn(ks[0], 1, 1, inp, planes_1x1)
    w_b30, b_b30 = _fold_bn(ks[1], 1, 1, inp, planes_3x3[0])
    w_b31, b_b31 = _fold_bn(ks[2], 3, 3, planes_3x3[0], planes_3x3[1])
    w_db0, b_db0 = _fold_bn(ks[3], 1, 1, inp, planes_3x3db[0])
    w_db1, b_db1 = _fold_bn(ks[4], 3, 3, planes_3x3db[0], planes_3x3db[1])
    w_db2, b_db2 = _fold_bn(ks[5], 3, 3, planes_3x3db[1], planes_3x3db[2])
    cat_c = planes_1x1 + planes_3x3[-1] + planes_3x3db[-1]
    w_m, b_m = _fold_bn(ks[6], 1, 1, cat_c, inp)

    def t1x1(w):   # HWIO (1,1,cin,cout) -> (cout, cin)
        return w.reshape(w.shape[2], w.shape[3]).T

    def taps(w):   # HWIO (3,3,cin,cout) -> (9, cout, cin), tap t = ky*3 + kx
        return jnp.transpose(w, (0, 1, 3, 2)).reshape(9, w.shape[3], w.shape[2])

    def col(b):    # (cout,) -> (cout, 1) column bias for the (C, HW) layout
        return b.reshape(-1, 1)

    # fused stem: the three 1x1 blocks share the same input x
    w_stem = jnp.concatenate([t1x1(w_b1), t1x1(w_b30), t1x1(w_db0)], axis=0)
    b_stem = jnp.concatenate([col(b_b1), col(b_b30), col(b_db0)], axis=0)

    # merge weight (Cin, cat_c) split along the concat axis (virtual concat)
    w_mT = t1x1(w_m)
    s1 = planes_1x1
    s2 = planes_1x1 + planes_3x3[-1]
    return {
        "w_stem": w_stem, "b_stem": b_stem,
        "w_b3": taps(w_b31), "b_b3": col(b_b31),
        "w_db1": taps(w_db1), "b_db1": col(b_db1),
        "w_db2": taps(w_db2), "b_db2": col(b_db2),
        "w_m1": w_mT[:, :s1], "w_m3": w_mT[:, s1:s2], "w_md": w_mT[:, s2:],
        "b_m": col(b_m),
    }


# ---------------------------------------------------------------------------
# Forward pass
# ---------------------------------------------------------------------------
def _pick_image_block(n):
    """Images per grid step: amortize the per-step overhead for large N while
    keeping >= 4 grid steps (>= 2 per TensorCore on v7x) when possible."""
    for b in (16, 8, 4, 2):
        if n % b == 0 and n // b >= 4:
            return b
    return 1


def inception_resnet_a(params, x_nchw):
    N, C, H, W = x_nchw.shape
    HW = H * W
    x = x_nchw.reshape(N, C, HW)        # free reshape: NCHW-native, pixels->lanes

    p1 = params["w_m1"].shape[1]
    p3_0 = params["w_b3"].shape[2]
    B = _pick_image_block(N)

    # boundary-validity masks for the 3x3 taps (shared by every image / conv)
    idx = jnp.arange(HW, dtype=jnp.int32)
    row, c = idx // W, idx % W
    masks = jnp.stack([row > 0, row < H - 1, c > 0, c < W - 1]
                      ).astype(jnp.float32)                       # (4, HW)

    kernel = functools.partial(_inception_resnet_a_kernel,
                               W=W, p1=p1, p3_0=p3_0)

    inv2 = lambda i: (0, 0)          # grid-invariant 2-D operands
    inv3 = lambda i: (0, 0, 0)       # grid-invariant 3-D tap weights

    out = pl.pallas_call(
        kernel,
        out_shape=jax.ShapeDtypeStruct((N, C, HW), x.dtype),
        grid_spec=pltpu.PrefetchScalarGridSpec(
            num_scalar_prefetch=0,
            grid=(N // B,),
            in_specs=[
                pl.BlockSpec((B, C, HW), lambda i: (i, 0, 0)),
                pl.BlockSpec(masks.shape, inv2),
                pl.BlockSpec(params["w_stem"].shape, inv2),
                pl.BlockSpec(params["b_stem"].shape, inv2),
                pl.BlockSpec(params["w_b3"].shape, inv3),
                pl.BlockSpec(params["b_b3"].shape, inv2),
                pl.BlockSpec(params["w_db1"].shape, inv3),
                pl.BlockSpec(params["b_db1"].shape, inv2),
                pl.BlockSpec(params["w_db2"].shape, inv3),
                pl.BlockSpec(params["b_db2"].shape, inv2),
                pl.BlockSpec(params["w_m1"].shape, inv2),
                pl.BlockSpec(params["w_m3"].shape, inv2),
                pl.BlockSpec(params["w_md"].shape, inv2),
                pl.BlockSpec(params["b_m"].shape, inv2),
            ],
            out_specs=pl.BlockSpec((B, C, HW), lambda i: (i, 0, 0)),
        ),
        compiler_params=pltpu.CompilerParams(
            dimension_semantics=("parallel",),     # v7x: grid shards over 2 TCs
            # per-step footprint is ~1-2 MiB; 32 MiB leaves ample headroom on
            # v5e/v6e (128 MiB) and stays well under v7x's 64 MiB per core.
            vmem_limit_bytes=32 * 1024 * 1024,
        ),
    )(x, masks,
      params["w_stem"], params["b_stem"],
      params["w_b3"], params["b_b3"],
      params["w_db1"], params["b_db1"],
      params["w_db2"], params["b_db2"],
      params["w_m1"], params["w_m3"], params["w_md"], params["b_m"])

    return out.reshape(N, C, H, W)                # free reshape back to NCHW


# ---------------------------------------------------------------------------
# Pure-JAX reference (same folded params) for a numerical sanity check
# ---------------------------------------------------------------------------
def _reference(params, x_nchw):
    x = jnp.transpose(x_nchw, (0, 2, 3, 1))       # NHWC, reference only
    N, H, W, C = x.shape
    p1 = params["w_m1"].shape[1]
    p3_0 = params["w_b3"].shape[2]

    def conv1x1(xx, w, b):                        # w: (cout, cin), b: (cout, 1)
        return jnp.maximum(jnp.einsum('nhwc,dc->nhwd', xx, w) + b[:, 0], 0.0)

    def conv3x3(xx, w9, b):                       # w9: (9, cout, cin)
        xp = jnp.pad(xx, ((0, 0), (1, 1), (1, 1), (0, 0)))
        acc = 0.0
        for ky in range(3):
            for kx in range(3):
                acc = acc + jnp.einsum('nhwc,dc->nhwd',
                                       xp[:, ky:ky + H, kx:kx + W, :],
                                       w9[ky * 3 + kx])
        return jnp.maximum(acc + b[:, 0], 0.0)

    stem = conv1x1(x, params["w_stem"], params["b_stem"])
    y1 = stem[..., :p1]
    y3 = conv3x3(stem[..., p1:p1 + p3_0], params["w_b3"], params["b_b3"])
    yd = conv3x3(stem[..., p1 + p3_0:], params["w_db1"], params["b_db1"])
    yd = conv3x3(yd, params["w_db2"], params["b_db2"])
    r = (jnp.einsum('nhwc,dc->nhwd', y1, params["w_m1"])
         + jnp.einsum('nhwc,dc->nhwd', y3, params["w_m3"])
         + jnp.einsum('nhwc,dc->nhwd', yd, params["w_md"])
         + params["b_m"][:, 0])
    out = jnp.maximum(x + jnp.maximum(r, 0.0), 0.0)
    return jnp.transpose(out, (0, 3, 1, 2))


if __name__ == "__main__":
    key = jax.random.PRNGKey(0)
    kx, kp = jax.random.split(key)
    # inp=4, planes_1x1=4, planes_3x3=[4, 6], planes_3x3db=[4, 6, 8]
    x = jax.random.normal(kx, (2, 4, 16, 16), jnp.float32)    # NCHW like PyTorch
    params = init_inception_resnet_a(kp, 4, 4, [4, 6], [4, 6, 8])

    fwd = jax.jit(functools.partial(inception_resnet_a, params))
    y = fwd(x)
    jax.block_until_ready(y)

    y_ref = _reference(params, x)
    assert y.shape == x.shape and y.dtype == x.dtype
    assert bool(jnp.all(y >= 0.0))                             # outer ReLU
    assert bool(jnp.allclose(y, y_ref, atol=1e-4, rtol=1e-4))  # matches reference
    print("KERNEL_OK")
</pallas_src>

<mosaic_0001>
module attributes {stable_mosaic.version = 11 : i64} {
  func.func @_inception_resnet_a_kernel(%arg0: i32, %arg1: memref<1x4x256xf32, #tpu.memory_space<vmem>>, %arg2: memref<4x256xf32, #tpu.memory_space<vmem>>, %arg3: memref<12x4xf32, #tpu.memory_space<vmem>>, %arg4: memref<12x1xf32, #tpu.memory_space<vmem>>, %arg5: memref<9x6x4xf32, #tpu.memory_space<vmem>>, %arg6: memref<6x1xf32, #tpu.memory_space<vmem>>, %arg7: memref<9x6x4xf32, #tpu.memory_space<vmem>>, %arg8: memref<6x1xf32, #tpu.memory_space<vmem>>, %arg9: memref<9x8x6xf32, #tpu.memory_space<vmem>>, %arg10: memref<8x1xf32, #tpu.memory_space<vmem>>, %arg11: memref<4x4xf32, #tpu.memory_space<vmem>>, %arg12: memref<4x6xf32, #tpu.memory_space<vmem>>, %arg13: memref<4x8xf32, #tpu.memory_space<vmem>>, %arg14: memref<4x1xf32, #tpu.memory_space<vmem>>, %arg15: memref<1x4x256xf32, #tpu.memory_space<vmem>>) attributes {dimension_semantics = [#tpu.dimension_semantics<parallel>], iteration_bounds = array<i64: 2>, scalar_prefetch = 0 : i64, scratch_operands = 0 : i64, tpu.core_type = #tpu.core_type<tc>, window_params = [{transform_indices = @transform_0, window_bounds = array<i64: 1, 4, 256>}, {pipeline_mode = #tpu.pipeline_mode<synchronous>, transform_indices = @transform_1, window_bounds = array<i64: 4, 256>}, {pipeline_mode = #tpu.pipeline_mode<synchronous>, transform_indices = @transform_2, window_bounds = array<i64: 12, 4>}, {pipeline_mode = #tpu.pipeline_mode<synchronous>, transform_indices = @transform_3, window_bounds = array<i64: 12, 1>}, {pipeline_mode = #tpu.pipeline_mode<synchronous>, transform_indices = @transform_4, window_bounds = array<i64: 9, 6, 4>}, {pipeline_mode = #tpu.pipeline_mode<synchronous>, transform_indices = @transform_5, window_bounds = array<i64: 6, 1>}, {pipeline_mode = #tpu.pipeline_mode<synchronous>, transform_indices = @transform_6, window_bounds = array<i64: 9, 6, 4>}, {pipeline_mode = #tpu.pipeline_mode<synchronous>, transform_indices = @transform_7, window_bounds = array<i64: 6, 1>}, {pipeline_mode = #tpu.pipeline_mode<synchronous>, transform_indices = @transform_8, window_bounds = array<i64: 9, 8, 6>}, {pipeline_mode = #tpu.pipeline_mode<synchronous>, transform_indices = @transform_9, window_bounds = array<i64: 8, 1>}, {pipeline_mode = #tpu.pipeline_mode<synchronous>, transform_indices = @transform_10, window_bounds = array<i64: 4, 4>}, {pipeline_mode = #tpu.pipeline_mode<synchronous>, transform_indices = @transform_11, window_bounds = array<i64: 4, 6>}, {pipeline_mode = #tpu.pipeline_mode<synchronous>, transform_indices = @transform_12, window_bounds = array<i64: 4, 8>}, {pipeline_mode = #tpu.pipeline_mode<synchronous>, transform_indices = @transform_13, window_bounds = array<i64: 4, 1>}, {transform_indices = @transform_14, window_bounds = array<i64: 1, 4, 256>}]} {
    %c0 = arith.constant 0 : index
    %c0_0 = arith.constant 0 : index
    %0 = vector.load %arg2[%c0, %c0_0] : memref<4x256xf32, #tpu.memory_space<vmem>>, vector<4x256xf32>
    %1 = vector.extract_strided_slice %0 {offsets = [0, 0], sizes = [1, 256], strides = [1, 1]} : vector<4x256xf32> to vector<1x256xf32>
    %2 = vector.extract_strided_slice %0 {offsets = [1, 0], sizes = [1, 256], strides = [1, 1]} : vector<4x256xf32> to vector<1x256xf32>
    %3 = vector.extract_strided_slice %0 {offsets = [2, 0], sizes = [1, 256], strides = [1, 1]} : vector<4x256xf32> to vector<1x256xf32>
    %4 = vector.extract_strided_slice %0 {offsets = [3, 0], sizes = [1, 256], strides = [1, 1]} : vector<4x256xf32> to vector<1x256xf32>
    %5 = arith.mulf %1, %3 : vector<1x256xf32>
    %6 = arith.mulf %1, %4 : vector<1x256xf32>
    %7 = arith.mulf %2, %3 : vector<1x256xf32>
    %8 = arith.mulf %2, %4 : vector<1x256xf32>
    %c0_1 = arith.constant 0 : index
    %c0_2 = arith.constant 0 : index
    %9 = vector.load %arg3[%c0_1, %c0_2] : memref<12x4xf32, #tpu.memory_space<vmem>>, vector<12x4xf32>
    %c0_3 = arith.constant 0 : index
    %c0_4 = arith.constant 0 : index
    %10 = vector.load %arg4[%c0_3, %c0_4] : memref<12x1xf32, #tpu.memory_space<vmem>>, vector<12x1xf32>
    %c0_5 = arith.constant 0 : index
    %c0_6 = arith.constant 0 : index
    %c0_7 = arith.constant 0 : index
    %11 = vector.load %arg5[%c0_5, %c0_6, %c0_7] : memref<9x6x4xf32, #tpu.memory_space<vmem>>, vector<9x6x4xf32>
    %c0_8 = arith.constant 0 : index
    %c0_9 = arith.constant 0 : index
    %12 = vector.load %arg6[%c0_8, %c0_9] : memref<6x1xf32, #tpu.memory_space<vmem>>, vector<6x1xf32>
    %c0_10 = arith.constant 0 : index
    %c0_11 = arith.constant 0 : index
    %c0_12 = arith.constant 0 : index
    %13 = vector.load %arg7[%c0_10, %c0_11, %c0_12] : memref<9x6x4xf32, #tpu.memory_space<vmem>>, vector<9x6x4xf32>
    %c0_13 = arith.constant 0 : index
    %c0_14 = arith.constant 0 : index
    %14 = vector.load %arg8[%c0_13, %c0_14] : memref<6x1xf32, #tpu.memory_space<vmem>>, vector<6x1xf32>
    %c0_15 = arith.constant 0 : index
    %c0_16 = arith.constant 0 : index
    %c0_17 = arith.constant 0 : index
    %15 = vector.load %arg9[%c0_15, %c0_16, %c0_17] : memref<9x8x6xf32, #tpu.memory_space<vmem>>, vector<9x8x6xf32>
    %c0_18 = arith.constant 0 : index
    %c0_19 = arith.constant 0 : index
    %16 = vector.load %arg10[%c0_18, %c0_19] : memref<8x1xf32, #tpu.memory_space<vmem>>, vector<8x1xf32>
    %c0_20 = arith.constant 0 : index
    %c0_21 = arith.constant 0 : index
    %17 = vector.load %arg11[%c0_20, %c0_21] : memref<4x4xf32, #tpu.memory_space<vmem>>, vector<4x4xf32>
    %c0_22 = arith.constant 0 : index
    %c0_23 = arith.constant 0 : index
    %18 = vector.load %arg12[%c0_22, %c0_23] : memref<4x6xf32, #tpu.memory_space<vmem>>, vector<4x6xf32>
    %c0_24 = arith.constant 0 : index
    %c0_25 = arith.constant 0 : index
    %19 = vector.load %arg13[%c0_24, %c0_25] : memref<4x8xf32, #tpu.memory_space<vmem>>, vector<4x8xf32>
    %c0_26 = arith.constant 0 : index
    %c0_27 = arith.constant 0 : index
    %20 = vector.load %arg14[%c0_26, %c0_27] : memref<4x1xf32, #tpu.memory_space<vmem>>, vector<4x1xf32>
    %c0_28 = arith.constant 0 : index
    %c0_29 = arith.constant 0 : index
    %c0_30 = arith.constant 0 : index
    %21 = vector.load %arg1[%c0_28, %c0_29, %c0_30] : memref<1x4x256xf32, #tpu.memory_space<vmem>>, vector<1x4x256xf32>
    %22 = vector.shape_cast %21 : vector<1x4x256xf32> to vector<4x256xf32>
    %cst = arith.constant dense<0.000000e+00> : vector<12x256xf32>
    %23 = tpu.matmul %9, %22, %cst {dimension_numbers = #tpu.dot_dimension_numbers<[1], [0], [0], [1], [0, 0, 1, 1], [], []>} : vector<12x4xf32>, vector<4x256xf32>, vector<12x256xf32> -> vector<12x256xf32>
    %24 = vector.broadcast %10 : vector<12x1xf32> to vector<12x256xf32>
    %25 = arith.addf %23, %24 : vector<12x256xf32>
    %cst_31 = arith.constant 0.000000e+00 : f32
    %26 = vector.broadcast %cst_31 : f32 to vector<12x256xf32>
    %27 = arith.maximumf %25, %26 : vector<12x256xf32>
    %28 = vector.extract_strided_slice %27 {offsets = [0, 0], sizes = [4, 256], strides = [1, 1]} : vector<12x256xf32> to vector<4x256xf32>
    %29 = vector.extract_strided_slice %27 {offsets = [4, 0], sizes = [4, 256], strides = [1, 1]} : vector<12x256xf32> to vector<4x256xf32>
    %cst_32 = arith.constant 0.000000e+00 : f32
    %30 = vector.broadcast %cst_32 : f32 to vector<6x256xf32>
    %c17_i32 = arith.constant 17 : i32
    %31 = tpu.dynamic_rotate %29 by %c17_i32 dim 1 : vector<4x256xf32>, i32 -> vector<4x256xf32>
    %32 = vector.broadcast %5 : vector<1x256xf32> to vector<4x256xf32>
    %33 = arith.mulf %31, %32 : vector<4x256xf32>
    %34 = vector.extract_strided_slice %11 {offsets = [0, 0, 0], sizes = [1, 6, 4], strides = [1, 1, 1]} : vector<9x6x4xf32> to vector<1x6x4xf32>
    %35 = vector.shape_cast %34 : vector<1x6x4xf32> to vector<6x4xf32>
    %cst_33 = arith.constant dense<0.000000e+00> : vector<6x256xf32>
    %36 = tpu.matmul %35, %33, %cst_33 {dimension_numbers = #tpu.dot_dimension_numbers<[1], [0], [0], [1], [0, 0, 1, 1], [], []>} : vector<6x4xf32>, vector<4x256xf32>, vector<6x256xf32> -> vector<6x256xf32>
    %37 = arith.addf %30, %36 : vector<6x256xf32>
    %c16_i32 = arith.constant 16 : i32
    %38 = tpu.dynamic_rotate %29 by %c16_i32 dim 1 : vector<4x256xf32>, i32 -> vector<4x256xf32>
    %39 = vector.broadcast %1 : vector<1x256xf32> to vector<4x256xf32>
    %40 = arith.mulf %38, %39 : vector<4x256xf32>
    %41 = vector.extract_strided_slice %11 {offsets = [1, 0, 0], sizes = [1, 6, 4], strides = [1, 1, 1]} : vector<9x6x4xf32> to vector<1x6x4xf32>
    %42 = vector.shape_cast %41 : vector<1x6x4xf32> to vector<6x4xf32>
    %cst_34 = arith.constant dense<0.000000e+00> : vector<6x256xf32>
    %43 = tpu.matmul %42, %40, %cst_34 {dimension_numbers = #tpu.dot_dimension_numbers<[1], [0], [0], [1], [0, 0, 1, 1], [], []>} : vector<6x4xf32>, vector<4x256xf32>, vector<6x256xf32> -> vector<6x256xf32>
    %44 = arith.addf %37, %43 : vector<6x256xf32>
    %c15_i32 = arith.constant 15 : i32
    %45 = tpu.dynamic_rotate %29 by %c15_i32 dim 1 : vector<4x256xf32>, i32 -> vector<4x256xf32>
    %46 = vector.broadcast %6 : vector<1x256xf32> to vector<4x256xf32>
    %47 = arith.mulf %45, %46 : vector<4x256xf32>
    %48 = vector.extract_strided_slice %11 {offsets = [2, 0, 0], sizes = [1, 6, 4], strides = [1, 1, 1]} : vector<9x6x4xf32> to vector<1x6x4xf32>
    %49 = vector.shape_cast %48 : vector<1x6x4xf32> to vector<6x4xf32>
    %cst_35 = arith.constant dense<0.000000e+00> : vector<6x256xf32>
    %50 = tpu.matmul %49, %47, %cst_35 {dimension_numbers = #tpu.dot_dimension_numbers<[1], [0], [0], [1], [0, 0, 1, 1], [], []>} : vector<6x4xf32>, vector<4x256xf32>, vector<6x256xf32> -> vector<6x256xf32>
    %51 = arith.addf %44, %50 : vector<6x256xf32>
    %c1_i32 = arith.constant 1 : i32
    %52 = tpu.dynamic_rotate %29 by %c1_i32 dim 1 : vector<4x256xf32>, i32 -> vector<4x256xf32>
    %53 = vector.broadcast %3 : vector<1x256xf32> to vector<4x256xf32>
    %54 = arith.mulf %52, %53 : vector<4x256xf32>
    %55 = vector.extract_strided_slice %11 {offsets = [3, 0, 0], sizes = [1, 6, 4], strides = [1, 1, 1]} : vector<9x6x4xf32> to vector<1x6x4xf32>
    %56 = vector.shape_cast %55 : vector<1x6x4xf32> to vector<6x4xf32>
    %cst_36 = arith.constant dense<0.000000e+00> : vector<6x256xf32>
    %57 = tpu.matmul %56, %54, %cst_36 {dimension_numbers = #tpu.dot_dimension_numbers<[1], [0], [0], [1], [0, 0, 1, 1], [], []>} : vector<6x4xf32>, vector<4x256xf32>, vector<6x256xf32> -> vector<6x256xf32>
    %58 = arith.addf %51, %57 : vector<6x256xf32>
    %59 = vector.extract_strided_slice %11 {offsets = [4, 0, 0], sizes = [1, 6, 4], strides = [1, 1, 1]} : vector<9x6x4xf32> to vector<1x6x4xf32>
    %60 = vector.shape_cast %59 : vector<1x6x4xf32> to vector<6x4xf32>
    %cst_37 = arith.constant dense<0.000000e+00> : vector<6x256xf32>
    %61 = tpu.matmul %60, %29, %cst_37 {dimension_numbers = #tpu.dot_dimension_numbers<[1], [0], [0], [1], [0, 0, 1, 1], [], []>} : vector<6x4xf32>, vector<4x256xf32>, vector<6x256xf32> -> vector<6x256xf32>
    %62 = arith.addf %58, %61 : vector<6x256xf32>
    %c255_i32 = arith.constant 255 : i32
    %63 = tpu.dynamic_rotate %29 by %c255_i32 dim 1 : vector<4x256xf32>, i32 -> vector<4x256xf32>
    %64 = vector.broadcast %4 : vector<1x256xf32> to vector<4x256xf32>
    %65 = arith.mulf %63, %64 : vector<4x256xf32>
    %66 = vector.extract_strided_slice %11 {offsets = [5, 0, 0], sizes = [1, 6, 4], strides = [1, 1, 1]} : vector<9x6x4xf32> to vector<1x6x4xf32>
    %67 = vector.shape_cast %66 : vector<1x6x4xf32> to vector<6x4xf32>
    %cst_38 = arith.constant dense<0.000000e+00> : vector<6x256xf32>
    %68 = tpu.matmul %67, %65, %cst_38 {dimension_numbers = #tpu.dot_dimension_numbers<[1], [0], [0], [1], [0, 0, 1, 1], [], []>} : vector<6x4xf32>, vector<4x256xf32>, vector<6x256xf32> -> vector<6x256xf32>
    %69 = arith.addf %62, %68 : vector<6x256xf32>
    %c241_i32 = arith.constant 241 : i32
    %70 = tpu.dynamic_rotate %29 by %c241_i32 dim 1 : vector<4x256xf32>, i32 -> vector<4x256xf32>
    %71 = vector.broadcast %7 : vector<1x256xf32> to vector<4x256xf32>
    %72 = arith.mulf %70, %71 : vector<4x256xf32>
    %73 = vector.extract_strided_slice %11 {offsets = [6, 0, 0], sizes = [1, 6, 4], strides = [1, 1, 1]} : vector<9x6x4xf32> to vector<1x6x4xf32>
    %74 = vector.shape_cast %73 : vector<1x6x4xf32> to vector<6x4xf32>
    %cst_39 = arith.constant dense<0.000000e+00> : vector<6x256xf32>
    %75 = tpu.matmul %74, %72, %cst_39 {dimension_numbers = #tpu.dot_dimension_numbers<[1], [0], [0], [1], [0, 0, 1, 1], [], []>} : vector<6x4xf32>, vector<4x256xf32>, vector<6x256xf32> -> vector<6x256xf32>
    %76 = arith.addf %69, %75 : vector<6x256xf32>
    %c240_i32 = arith.constant 240 : i32
    %77 = tpu.dynamic_rotate %29 by %c240_i32 dim 1 : vector<4x256xf32>, i32 -> vector<4x256xf32>
    %78 = vector.broadcast %2 : vector<1x256xf32> to vector<4x256xf32>
    %79 = arith.mulf %77, %78 : vector<4x256xf32>
    %80 = vector.extract_strided_slice %11 {offsets = [7, 0, 0], sizes = [1, 6, 4], strides = [1, 1, 1]} : vector<9x6x4xf32> to vector<1x6x4xf32>
    %81 = vector.shape_cast %80 : vector<1x6x4xf32> to vector<6x4xf32>
    %cst_40 = arith.constant dense<0.000000e+00> : vector<6x256xf32>
    %82 = tpu.matmul %81, %79, %cst_40 {dimension_numbers = #tpu.dot_dimension_numbers<[1], [0], [0], [1], [0, 0, 1, 1], [], []>} : vector<6x4xf32>, vector<4x256xf32>, vector<6x256xf32> -> vector<6x256xf32>
    %83 = arith.addf %76, %82 : vector<6x256xf32>
    %c239_i32 = arith.constant 239 : i32
    %84 = tpu.dynamic_rotate %29 by %c239_i32 dim 1 : vector<4x256xf32>, i32 -> vector<4x256xf32>
    %85 = vector.broadcast %8 : vector<1x256xf32> to vector<4x256xf32>
    %86 = arith.mulf %84, %85 : vector<4x256xf32>
    %87 = vector.extract_strided_slice %11 {offsets = [8, 0, 0], sizes = [1, 6, 4], strides = [1, 1, 1]} : vector<9x6x4xf32> to vector<1x6x4xf32>
    %88 = vector.shape_cast %87 : vector<1x6x4xf32> to vector<6x4xf32>
    %cst_41 = arith.constant dense<0.000000e+00> : vector<6x256xf32>
    %89 = tpu.matmul %88, %86, %cst_41 {dimension_numbers = #tpu.dot_dimension_numbers<[1], [0], [0], [1], [0, 0, 1, 1], [], []>} : vector<6x4xf32>, vector<4x256xf32>, vector<6x256xf32> -> vector<6x256xf32>
    %90 = arith.addf %83, %89 : vector<6x256xf32>
    %91 = vector.broadcast %12 : vector<6x1xf32> to vector<6x256xf32>
    %92 = arith.addf %90, %91 : vector<6x256xf32>
    %cst_42 = arith.constant 0.000000e+00 : f32
    %93 = vector.broadcast %cst_42 : f32 to vector<6x256xf32>
    %94 = arith.maximumf %92, %93 : vector<6x256xf32>
    %95 = vector.extract_strided_slice %27 {offsets = [8, 0], sizes = [4, 256], strides = [1, 1]} : vector<12x256xf32> to vector<4x256xf32>
    %cst_43 = arith.constant 0.000000e+00 : f32
    %96 = vector.broadcast %cst_43 : f32 to vector<6x256xf32>
    %c17_i32_44 = arith.constant 17 : i32
    %97 = tpu.dynamic_rotate %95 by %c17_i32_44 dim 1 : vector<4x256xf32>, i32 -> vector<4x256xf32>
    %98 = vector.broadcast %5 : vector<1x256xf32> to vector<4x256xf32>
    %99 = arith.mulf %97, %98 : vector<4x256xf32>
    %100 = vector.extract_strided_slice %13 {offsets = [0, 0, 0], sizes = [1, 6, 4], strides = [1, 1, 1]} : vector<9x6x4xf32> to vector<1x6x4xf32>
    %101 = vector.shape_cast %100 : vector<1x6x4xf32> to vector<6x4xf32>
    %cst_45 = arith.constant dense<0.000000e+00> : vector<6x256xf32>
    %102 = tpu.matmul %101, %99, %cst_45 {dimension_numbers = #tpu.dot_dimension_numbers<[1], [0], [0], [1], [0, 0, 1, 1], [], []>} : vector<6x4xf32>, vector<4x256xf32>, vector<6x256xf32> -> vector<6x256xf32>
    %103 = arith.addf %96, %102 : vector<6x256xf32>
    %c16_i32_46 = arith.constant 16 : i32
    %104 = tpu.dynamic_rotate %95 by %c16_i32_46 dim 1 : vector<4x256xf32>, i32 -> vector<4x256xf32>
    %105 = vector.broadcast %1 : vector<1x256xf32> to vector<4x256xf32>
    %106 = arith.mulf %104, %105 : vector<4x256xf32>
    %107 = vector.extract_strided_slice %13 {offsets = [1, 0, 0], sizes = [1, 6, 4], strides = [1, 1, 1]} : vector<9x6x4xf32> to vector<1x6x4xf32>
    %108 = vector.shape_cast %107 : vector<1x6x4xf32> to vector<6x4xf32>
    %cst_47 = arith.constant dense<0.000000e+00> : vector<6x256xf32>
    %109 = tpu.matmul %108, %106, %cst_47 {dimension_numbers = #tpu.dot_dimension_numbers<[1], [0], [0], [1], [0, 0, 1, 1], [], []>} : vector<6x4xf32>, vector<4x256xf32>, vector<6x256xf32> -> vector<6x256xf32>
    %110 = arith.addf %103, %109 : vector<6x256xf32>
    %c15_i32_48 = arith.constant 15 : i32
    %111 = tpu.dynamic_rotate %95 by %c15_i32_48 dim 1 : vector<4x256xf32>, i32 -> vector<4x256xf32>
    %112 = vector.broadcast %6 : vector<1x256xf32> to vector<4x256xf32>
    %113 = arith.mulf %111, %112 : vector<4x256xf32>
    %114 = vector.extract_strided_slice %13 {offsets = [2, 0, 0], sizes = [1, 6, 4], strides = [1, 1, 1]} : vector<9x6x4xf32> to vector<1x6x4xf32>
    %115 = vector.shape_cast %114 : vector<1x6x4xf32> to vector<6x4xf32>
    %cst_49 = arith.constant dense<0.000000e+00> : vector<6x256xf32>
    %116 = tpu.matmul %115, %113, %cst_49 {dimension_numbers = #tpu.dot_dimension_numbers<[1], [0], [0], [1], [0, 0, 1, 1], [], []>} : vector<6x4xf32>, vector<4x256xf32>, vector<6x256xf32> -> vector<6x256xf32>
    %117 = arith.addf %110, %116 : vector<6x256xf32>
    %c1_i32_50 = arith.constant 1 : i32
    %118 = tpu.dynamic_rotate %95 by %c1_i32_50 dim 1 : vector<4x256xf32>, i32 -> vector<4x256xf32>
    %119 = vector.broadcast %3 : vector<1x256xf32> to vector<4x256xf32>
    %120 = arith.mulf %118, %119 : vector<4x256xf32>
    %121 = vector.extract_strided_slice %13 {offsets = [3, 0, 0], sizes = [1, 6, 4], strides = [1, 1, 1]} : vector<9x6x4xf32> to vector<1x6x4xf32>
    %122 = vector.shape_cast %121 : vector<1x6x4xf32> to vector<6x4xf32>
    %cst_51 = arith.constant dense<0.000000e+00> : vector<6x256xf32>
    %123 = tpu.matmul %122, %120, %cst_51 {dimension_numbers = #tpu.dot_dimension_numbers<[1], [0], [0], [1], [0, 0, 1, 1], [], []>} : vector<6x4xf32>, vector<4x256xf32>, vector<6x256xf32> -> vector<6x256xf32>
    %124 = arith.addf %117, %123 : vector<6x256xf32>
    %125 = vector.extract_strided_slice %13 {offsets = [4, 0, 0], sizes = [1, 6, 4], strides = [1, 1, 1]} : vector<9x6x4xf32> to vector<1x6x4xf32>
    %126 = vector.shape_cast %125 : vector<1x6x4xf32> to vector<6x4xf32>
    %cst_52 = arith.constant dense<0.000000e+00> : vector<6x256xf32>
    %127 = tpu.matmul %126, %95, %cst_52 {dimension_numbers = #tpu.dot_dimension_numbers<[1], [0], [0], [1], [0, 0, 1, 1], [], []>} : vector<6x4xf32>, vector<4x256xf32>, vector<6x256xf32> -> vector<6x256xf32>
    %128 = arith.addf %124, %127 : vector<6x256xf32>
    %c255_i32_53 = arith.constant 255 : i32
    %129 = tpu.dynamic_rotate %95 by %c255_i32_53 dim 1 : vector<4x256xf32>, i32 -> vector<4x256xf32>
    %130 = vector.broadcast %4 : vector<1x256xf32> to vector<4x256xf32>
    %131 = arith.mulf %129, %130 : vector<4x256xf32>
    %132 = vector.extract_strided_slice %13 {offsets = [5, 0, 0], sizes = [1, 6, 4], strides = [1, 1, 1]} : vector<9x6x4xf32> to vector<1x6x4xf32>
    %133 = vector.shape_cast %132 : vector<1x6x4xf32> to vector<6x4xf32>
    %cst_54 = arith.constant dense<0.000000e+00> : vector<6x256xf32>
    %134 = tpu.matmul %133, %131, %cst_54 {dimension_numbers = #tpu.dot_dimension_numbers<[1], [0], [0], [1], [0, 0, 1, 1], [], []>} : vector<6x4xf32>, vector<4x256xf32>, vector<6x256xf32> -> vector<6x256xf32>
    %135 = arith.addf %128, %134 : vector<6x256xf32>
    %c241_i32_55 = arith.constant 241 : i32
    %136 = tpu.dynamic_rotate %95 by %c241_i32_55 dim 1 : vector<4x256xf32>, i32 -> vector<4x256xf32>
    %137 = vector.broadcast %7 : vector<1x256xf32> to vector<4x256xf32>
    %138 = arith.mulf %136, %137 : vector<4x256xf32>
    %139 = vector.extract_strided_slice %13 {offsets = [6, 0, 0], sizes = [1, 6, 4], strides = [1, 1, 1]} : vector<9x6x4xf32> to vector<1x6x4xf32>
    %140 = vector.shape_cast %139 : vector<1x6x4xf32> to vector<6x4xf32>
    %cst_56 = arith.constant dense<0.000000e+00> : vector<6x256xf32>
    %141 = tpu.matmul %140, %138, %cst_56 {dimension_numbers = #tpu.dot_dimension_numbers<[1], [0], [0], [1], [0, 0, 1, 1], [], []>} : vector<6x4xf32>, vector<4x256xf32>, vector<6x256xf32> -> vector<6x256xf32>
    %142 = arith.addf %135, %141 : vector<6x256xf32>
    %c240_i32_57 = arith.constant 240 : i32
    %143 = tpu.dynamic_rotate %95 by %c240_i32_57 dim 1 : vector<4x256xf32>, i32 -> vector<4x256xf32>
    %144 = vector.broadcast %2 : vector<1x256xf32> to vector<4x256xf32>
    %145 = arith.mulf %143, %144 : vector<4x256xf32>
    %146 = vector.extract_strided_slice %13 {offsets = [7, 0, 0], sizes = [1, 6, 4], strides = [1, 1, 1]} : vector<9x6x4xf32> to vector<1x6x4xf32>
    %147 = vector.shape_cast %146 : vector<1x6x4xf32> to vector<6x4xf32>
    %cst_58 = arith.constant dense<0.000000e+00> : vector<6x256xf32>
    %148 = tpu.matmul %147, %145, %cst_58 {dimension_numbers = #tpu.dot_dimension_numbers<[1], [0], [0], [1], [0, 0, 1, 1], [], []>} : vector<6x4xf32>, vector<4x256xf32>, vector<6x256xf32> -> vector<6x256xf32>
    %149 = arith.addf %142, %148 : vector<6x256xf32>
    %c239_i32_59 = arith.constant 239 : i32
    %150 = tpu.dynamic_rotate %95 by %c239_i32_59 dim 1 : vector<4x256xf32>, i32 -> vector<4x256xf32>
    %151 = vector.broadcast %8 : vector<1x256xf32> to vector<4x256xf32>
    %152 = arith.mulf %150, %151 : vector<4x256xf32>
    %153 = vector.extract_strided_slice %13 {offsets = [8, 0, 0], sizes = [1, 6, 4], strides = [1, 1, 1]} : vector<9x6x4xf32> to vector<1x6x4xf32>
    %154 = vector.shape_cast %153 : vector<1x6x4xf32> to vector<6x4xf32>
    %cst_60 = arith.constant dense<0.000000e+00> : vector<6x256xf32>
    %155 = tpu.matmul %154, %152, %cst_60 {dimension_numbers = #tpu.dot_dimension_numbers<[1], [0], [0], [1], [0, 0, 1, 1], [], []>} : vector<6x4xf32>, vector<4x256xf32>, vector<6x256xf32> -> vector<6x256xf32>
    %156 = arith.addf %149, %155 : vector<6x256xf32>
    %157 = vector.broadcast %14 : vector<6x1xf32> to vector<6x256xf32>
    %158 = arith.addf %156, %157 : vector<6x256xf32>
    %cst_61 = arith.constant 0.000000e+00 : f32
    %159 = vector.broadcast %cst_61 : f32 to vector<6x256xf32>
    %160 = arith.maximumf %158, %159 : vector<6x256xf32>
    %cst_62 = arith.constant 0.000000e+00 : f32
    %161 = vector.broadcast %cst_62 : f32 to vector<8x256xf32>
    %c17_i32_63 = arith.constant 17 : i32
    %162 = tpu.dynamic_rotate %160 by %c17_i32_63 dim 1 : vector<6x256xf32>, i32 -> vector<6x256xf32>
    %163 = vector.broadcast %5 : vector<1x256xf32> to vector<6x256xf32>
    %164 = arith.mulf %162, %163 : vector<6x256xf32>
    %165 = vector.extract_strided_slice %15 {offsets = [0, 0, 0], sizes = [1, 8, 6], strides = [1, 1, 1]} : vector<9x8x6xf32> to vector<1x8x6xf32>
    %166 = vector.shape_cast %165 : vector<1x8x6xf32> to vector<8x6xf32>
    %cst_64 = arith.constant dense<0.000000e+00> : vector<8x256xf32>
    %167 = tpu.matmul %166, %164, %cst_64 {dimension_numbers = #tpu.dot_dimension_numbers<[1], [0], [0], [1], [0, 0, 1, 1], [], []>} : vector<8x6xf32>, vector<6x256xf32>, vector<8x256xf32> -> vector<8x256xf32>
    %168 = arith.addf %161, %167 : vector<8x256xf32>
    %c16_i32_65 = arith.constant 16 : i32
    %169 = tpu.dynamic_rotate %160 by %c16_i32_65 dim 1 : vector<6x256xf32>, i32 -> vector<6x256xf32>
    %170 = vector.broadcast %1 : vector<1x256xf32> to vector<6x256xf32>
    %171 = arith.mulf %169, %170 : vector<6x256xf32>
    %172 = vector.extract_strided_slice %15 {offsets = [1, 0, 0], sizes = [1, 8, 6], strides = [1, 1, 1]} : vector<9x8x6xf32> to vector<1x8x6xf32>
    %173 = vector.shape_cast %172 : vector<1x8x6xf32> to vector<8x6xf32>
    %cst_66 = arith.constant dense<0.000000e+00> : vector<8x256xf32>
    %174 = tpu.matmul %173, %171, %cst_66 {dimension_numbers = #tpu.dot_dimension_numbers<[1], [0], [0], [1], [0, 0, 1, 1], [], []>} : vector<8x6xf32>, vector<6x256xf32>, vector<8x256xf32> -> vector<8x256xf32>
    %175 = arith.addf %168, %174 : vector<8x256xf32>
    %c15_i32_67 = arith.constant 15 : i32
    %176 = tpu.dynamic_rotate %160 by %c15_i32_67 dim 1 : vector<6x256xf32>, i32 -> vector<6x256xf32>
    %177 = vector.broadcast %6 : vector<1x256xf32> to vector<6x256xf32>
    %178 = arith.mulf %176, %177 : vector<6x256xf32>
    %179 = vector.extract_strided_slice %15 {offsets = [2, 0, 0], sizes = [1, 8, 6], strides = [1, 1, 1]} : vector<9x8x6xf32> to vector<1x8x6xf32>
    %180 = vector.shape_cast %179 : vector<1x8x6xf32> to vector<8x6xf32>
    %cst_68 = arith.constant dense<0.000000e+00> : vector<8x256xf32>
    %181 = tpu.matmul %180, %178, %cst_68 {dimension_numbers = #tpu.dot_dimension_numbers<[1], [0], [0], [1], [0, 0, 1, 1], [], []>} : vector<8x6xf32>, vector<6x256xf32>, vector<8x256xf32> -> vector<8x256xf32>
    %182 = arith.addf %175, %181 : vector<8x256xf32>
    %c1_i32_69 = arith.constant 1 : i32
    %183 = tpu.dynamic_rotate %160 by %c1_i32_69 dim 1 : vector<6x256xf32>, i32 -> vector<6x256xf32>
    %184 = vector.broadcast %3 : vector<1x256xf32> to vector<6x256xf32>
    %185 = arith.mulf %183, %184 : vector<6x256xf32>
    %186 = vector.extract_strided_slice %15 {offsets = [3, 0, 0], sizes = [1, 8, 6], strides = [1, 1, 1]} : vector<9x8x6xf32> to vector<1x8x6xf32>
    %187 = vector.shape_cast %186 : vector<1x8x6xf32> to vector<8x6xf32>
    %cst_70 = arith.constant dense<0.000000e+00> : vector<8x256xf32>
    %188 = tpu.matmul %187, %185, %cst_70 {dimension_numbers = #tpu.dot_dimension_numbers<[1], [0], [0], [1], [0, 0, 1, 1], [], []>} : vector<8x6xf32>, vector<6x256xf32>, vector<8x256xf32> -> vector<8x256xf32>
    %189 = arith.addf %182, %188 : vector<8x256xf32>
    %190 = vector.extract_strided_slice %15 {offsets = [4, 0, 0], sizes = [1, 8, 6], strides = [1, 1, 1]} : vector<9x8x6xf32> to vector<1x8x6xf32>
    %191 = vector.shape_cast %190 : vector<1x8x6xf32> to vector<8x6xf32>
    %cst_71 = arith.constant dense<0.000000e+00> : vector<8x256xf32>
    %192 = tpu.matmul %191, %160, %cst_71 {dimension_numbers = #tpu.dot_dimension_numbers<[1], [0], [0], [1], [0, 0, 1, 1], [], []>} : vector<8x6xf32>, vector<6x256xf32>, vector<8x256xf32> -> vector<8x256xf32>
    %193 = arith.addf %189, %192 : vector<8x256xf32>
    %c255_i32_72 = arith.constant 255 : i32
    %194 = tpu.dynamic_rotate %160 by %c255_i32_72 dim 1 : vector<6x256xf32>, i32 -> vector<6x256xf32>
    %195 = vector.broadcast %4 : vector<1x256xf32> to vector<6x256xf32>
    %196 = arith.mulf %194, %195 : vector<6x256xf32>
    %197 = vector.extract_strided_slice %15 {offsets = [5, 0, 0], sizes = [1, 8, 6], strides = [1, 1, 1]} : vector<9x8x6xf32> to vector<1x8x6xf32>
    %198 = vector.shape_cast %197 : vector<1x8x6xf32> to vector<8x6xf32>
    %cst_73 = arith.constant dense<0.000000e+00> : vector<8x256xf32>
    %199 = tpu.matmul %198, %196, %cst_73 {dimension_numbers = #tpu.dot_dimension_numbers<[1], [0], [0], [1], [0, 0, 1, 1], [], []>} : vector<8x6xf32>, vector<6x256xf32>, vector<8x256xf32> -> vector<8x256xf32>
    %200 = arith.addf %193, %199 : vector<8x256xf32>
    %c241_i32_74 = arith.constant 241 : i32
    %201 = tpu.dynamic_rotate %160 by %c241_i32_74 dim 1 : vector<6x256xf32>, i32 -> vector<6x256xf32>
    %202 = vector.broadcast %7 : vector<1x256xf32> to vector<6x256xf32>
    %203 = arith.mulf %201, %202 : vector<6x256xf32>
    %204 = vector.extract_strided_slice %15 {offsets = [6, 0, 0], sizes = [1, 8, 6], strides = [1, 1, 1]} : vector<9x8x6xf32> to vector<1x8x6xf32>
    %205 = vector.shape_cast %204 : vector<1x8x6xf32> to vector<8x6xf32>
    %cst_75 = arith.constant dense<0.000000e+00> : vector<8x256xf32>
    %206 = tpu.matmul %205, %203, %cst_75 {dimension_numbers = #tpu.dot_dimension_numbers<[1], [0], [0], [1], [0, 0, 1, 1], [], []>} : vector<8x6xf32>, vector<6x256xf32>, vector<8x256xf32> -> vector<8x256xf32>
    %207 = arith.addf %200, %206 : vector<8x256xf32>
    %c240_i32_76 = arith.constant 240 : i32
    %208 = tpu.dynamic_rotate %160 by %c240_i32_76 dim 1 : vector<6x256xf32>, i32 -> vector<6x256xf32>
    %209 = vector.broadcast %2 : vector<1x256xf32> to vector<6x256xf32>
    %210 = arith.mulf %208, %209 : vector<6x256xf32>
    %211 = vector.extract_strided_slice %15 {offsets = [7, 0, 0], sizes = [1, 8, 6], strides = [1, 1, 1]} : vector<9x8x6xf32> to vector<1x8x6xf32>
    %212 = vector.shape_cast %211 : vector<1x8x6xf32> to vector<8x6xf32>
    %cst_77 = arith.constant dense<0.000000e+00> : vector<8x256xf32>
    %213 = tpu.matmul %212, %210, %cst_77 {dimension_numbers = #tpu.dot_dimension_numbers<[1], [0], [0], [1], [0, 0, 1, 1], [], []>} : vector<8x6xf32>, vector<6x256xf32>, vector<8x256xf32> -> vector<8x256xf32>
    %214 = arith.addf %207, %213 : vector<8x256xf32>
    %c239_i32_78 = arith.constant 239 : i32
    %215 = tpu.dynamic_rotate %160 by %c239_i32_78 dim 1 : vector<6x256xf32>, i32 -> vector<6x256xf32>
    %216 = vector.broadcast %8 : vector<1x256xf32> to vector<6x256xf32>
    %217 = arith.mulf %215, %216 : vector<6x256xf32>
    %218 = vector.extract_strided_slice %15 {offsets = [8, 0, 0], sizes = [1, 8, 6], strides = [1, 1, 1]} : vector<9x8x6xf32> to vector<1x8x6xf32>
    %219 = vector.shape_cast %218 : vector<1x8x6xf32> to vector<8x6xf32>
    %cst_79 = arith.constant dense<0.000000e+00> : vector<8x256xf32>
    %220 = tpu.matmul %219, %217, %cst_79 {dimension_numbers = #tpu.dot_dimension_numbers<[1], [0], [0], [1], [0, 0, 1, 1], [], []>} : vector<8x6xf32>, vector<6x256xf32>, vector<8x256xf32> -> vector<8x256xf32>
    %221 = arith.addf %214, %220 : vector<8x256xf32>
    %222 = vector.broadcast %16 : vector<8x1xf32> to vector<8x256xf32>
    %223 = arith.addf %221, %222 : vector<8x256xf32>
    %cst_80 = arith.constant 0.000000e+00 : f32
    %224 = vector.broadcast %cst_80 : f32 to vector<8x256xf32>
    %225 = arith.maximumf %223, %224 : vector<8x256xf32>
    %cst_81 = arith.constant dense<0.000000e+00> : vector<4x256xf32>
    %226 = tpu.matmul %17, %28, %cst_81 {dimension_numbers = #tpu.dot_dimension_numbers<[1], [0], [0], [1], [0, 0, 1, 1], [], []>} : vector<4x4xf32>, vector<4x256xf32>, vector<4x256xf32> -> vector<4x256xf32>
    %cst_82 = arith.constant dense<0.000000e+00> : vector<4x256xf32>
    %227 = tpu.matmul %18, %94, %cst_82 {dimension_numbers = #tpu.dot_dimension_numbers<[1], [0], [0], [1], [0, 0, 1, 1], [], []>} : vector<4x6xf32>, vector<6x256xf32>, vector<4x256xf32> -> vector<4x256xf32>
    %228 = arith.addf %226, %227 : vector<4x256xf32>
    %cst_83 = arith.constant dense<0.000000e+00> : vector<4x256xf32>
    %229 = tpu.matmul %19, %225, %cst_83 {dimension_numbers = #tpu.dot_dimension_numbers<[1], [0], [0], [1], [0, 0, 1, 1], [], []>} : vector<4x8xf32>, vector<8x256xf32>, vector<4x256xf32> -> vector<4x256xf32>
    %230 = arith.addf %228, %229 : vector<4x256xf32>
    %231 = vector.broadcast %20 : vector<4x1xf32> to vector<4x256xf32>
    %232 = arith.addf %230, %231 : vector<4x256xf32>
    %cst_84 = arith.constant 0.000000e+00 : f32
    %233 = vector.broadcast %cst_84 : f32 to vector<4x256xf32>
    %234 = arith.maximumf %232, %233 : vector<4x256xf32>
    %235 = arith.addf %22, %234 : vector<4x256xf32>
    %cst_85 = arith.constant 0.000000e+00 : f32
    %236 = vector.broadcast %cst_85 : f32 to vector<4x256xf32>
    %237 = arith.maximumf %235, %236 : vector<4x256xf32>
    %c0_86 = arith.constant 0 : index
    %c0_87 = arith.constant 0 : index
    %c0_88 = arith.constant 0 : index
    %238 = vector.load %arg15[%c0_86, %c0_87, %c0_88] : memref<1x4x256xf32, #tpu.memory_space<vmem>>, vector<1x4x256xf32>
    %239 = vector.shape_cast %238 : vector<1x4x256xf32> to vector<4x256xf32>
    %240 = vector.shape_cast %237 : vector<4x256xf32> to vector<1x4x256xf32>
    tpu.vector_store %arg15[%c0_86, %c0_87, %c0_88], %240 {strides = array<i32>} : memref<1x4x256xf32, #tpu.memory_space<vmem>>, vector<1x4x256xf32>,
    return
  }
  func.func @transform_0(%arg0: i32) -> (i32, i32, i32) {
    %c0_i32 = arith.constant 0 : i32
    %c0_i32_0 = arith.constant 0 : i32
    %c0_i32_1 = arith.constant 0 : i32
    return %arg0, %c0_i32, %c0_i32_0 : i32, i32, i32
  }
  func.func @transform_1(%arg0: i32) -> (i32, i32) {
    %c0_i32 = arith.constant 0 : i32
    %c0_i32_0 = arith.constant 0 : i32
    %c0_i32_1 = arith.constant 0 : i32
    return %c0_i32, %c0_i32_0 : i32, i32
  }
  func.func @transform_2(%arg0: i32) -> (i32, i32) {
    %c0_i32 = arith.constant 0 : i32
    %c0_i32_0 = arith.constant 0 : i32
    %c0_i32_1 = arith.constant 0 : i32
    return %c0_i32, %c0_i32_0 : i32, i32
  }
  func.func @transform_3(%arg0: i32) -> (i32, i32) {
    %c0_i32 = arith.constant 0 : i32
    %c0_i32_0 = arith.constant 0 : i32
    %c0_i32_1 = arith.constant 0 : i32
    return %c0_i32, %c0_i32_0 : i32, i32
  }
  func.func @transform_4(%arg0: i32) -> (i32, i32, i32) {
    %c0_i32 = arith.constant 0 : i32
    %c0_i32_0 = arith.constant 0 : i32
    %c0_i32_1 = arith.constant 0 : i32
    %c0_i32_2 = arith.constant 0 : i32
    return %c0_i32, %c0_i32_0, %c0_i32_1 : i32, i32, i32
  }
  func.func @transform_5(%arg0: i32) -> (i32, i32) {
    %c0_i32 = arith.constant 0 : i32
    %c0_i32_0 = arith.constant 0 : i32
    %c0_i32_1 = arith.constant 0 : i32
    return %c0_i32, %c0_i32_0 : i32, i32
  }
  func.func @transform_6(%arg0: i32) -> (i32, i32, i32) {
    %c0_i32 = arith.constant 0 : i32
    %c0_i32_0 = arith.constant 0 : i32
    %c0_i32_1 = arith.constant 0 : i32
    %c0_i32_2 = arith.constant 0 : i32
    return %c0_i32, %c0_i32_0, %c0_i32_1 : i32, i32, i32
  }
  func.func @transform_7(%arg0: i32) -> (i32, i32) {
    %c0_i32 = arith.constant 0 : i32
    %c0_i32_0 = arith.constant 0 : i32
    %c0_i32_1 = arith.constant 0 : i32
    return %c0_i32, %c0_i32_0 : i32, i32
  }
  func.func @transform_8(%arg0: i32) -> (i32, i32, i32) {
    %c0_i32 = arith.constant 0 : i32
    %c0_i32_0 = arith.constant 0 : i32
    %c0_i32_1 = arith.constant 0 : i32
    %c0_i32_2 = arith.constant 0 : i32
    return %c0_i32, %c0_i32_0, %c0_i32_1 : i32, i32, i32
  }
  func.func @transform_9(%arg0: i32) -> (i32, i32) {
    %c0_i32 = arith.constant 0 : i32
    %c0_i32_0 = arith.constant 0 : i32
    %c0_i32_1 = arith.constant 0 : i32
    return %c0_i32, %c0_i32_0 : i32, i32
  }
  func.func @transform_10(%arg0: i32) -> (i32, i32) {
    %c0_i32 = arith.constant 0 : i32
    %c0_i32_0 = arith.constant 0 : i32
    %c0_i32_1 = arith.constant 0 : i32
    return %c0_i32, %c0_i32_0 : i32, i32
  }
  func.func @transform_11(%arg0: i32) -> (i32, i32) {
    %c0_i32 = arith.constant 0 : i32
    %c0_i32_0 = arith.constant 0 : i32
    %c0_i32_1 = arith.constant 0 : i32
    return %c0_i32, %c0_i32_0 : i32, i32
  }
  func.func @transform_12(%arg0: i32) -> (i32, i32) {
    %c0_i32 = arith.constant 0 : i32
    %c0_i32_0 = arith.constant 0 : i32
    %c0_i32_1 = arith.constant 0 : i32
    return %c0_i32, %c0_i32_0 : i32, i32
  }
  func.func @transform_13(%arg0: i32) -> (i32, i32) {
    %c0_i32 = arith.constant 0 : i32
    %c0_i32_0 = arith.constant 0 : i32
    %c0_i32_1 = arith.constant 0 : i32
    return %c0_i32, %c0_i32_0 : i32, i32
  }
  func.func @transform_14(%arg0: i32) -> (i32, i32, i32) {
    %c0_i32 = arith.constant 0 : i32
    %c0_i32_0 = arith.constant 0 : i32
    %c0_i32_1 = arith.constant 0 : i32
    return %arg0, %c0_i32, %c0_i32_0 : i32, i32, i32
  }
}

</mosaic_0001>

<bundles_post_ra>
// kernel: inception_resnet_a.1
= control target key start
LH: loop header
LB: loop body
LE: loop exit
PB: predicated region body
PF: predicated region fallthrough
CT: control target
= control target key end

     0   :  { %19 = vsyncpa [#allocation3], 0  ;;  %s4745_s0 = inlined_call_operand.vmem [shape: f32[2,4,256], index: 0, kind: input, shape index: {}]   ;;  %s4746_s1 = inlined_call_operand.vmem [shape: f32[4,256], index: 1, kind: input, shape index: {}]   ;;  %s4747_s2 = inlined_call_operand.vmem [shape: f32[12,4], index: 2, kind: input, shape index: {}]   ;;  %s4748_s3 = inlined_call_operand.vmem [shape: f32[12,1], index: 3, kind: input, shape index: {}]   ;;  %s4749_s4 = inlined_call_operand.hbm [shape: f32[9,6,4], index: 4, kind: input, shape index: {}]   ;;  %s4750_s5 = inlined_call_operand.hbm [shape: f32[6,1], index: 5, kind: input, shape index: {}]   ;;  %s4751_s6 = inlined_call_operand.vmem [shape: f32[9,6,4], index: 6, kind: input, shape index: {}]   ;;  %s4752_s7 = inlined_call_operand.hbm [shape: f32[6,1], index: 7, kind: input, shape index: {}]   ;;  %s4753_s8 = inlined_call_operand.vmem [shape: f32[9,8,6], index: 8, kind: input, shape index: {}]   ;;  %s4754_s9 = inlined_call_operand.vmem [shape: f32[8,1], index: 9, kind: input, shape index: {}]   ;;  %s4755_s10 = inlined_call_operand.hbm [shape: f32[4,4], index: 10, kind: input, shape index: {}]   ;;  %s4756_s11 = inlined_call_operand.hbm [shape: f32[4,6], index: 11, kind: input, shape index: {}]   ;;  %s4757_s12 = inlined_call_operand.vmem [shape: f32[4,8], index: 12, kind: input, shape index: {}]   ;;  %s4758_s13 = inlined_call_operand.vmem [shape: f32[4,1], index: 13, kind: input, shape index: {}]   ;;  %s4759_s14 = inlined_call_operand.vmem [shape: f32[2,4,256], index: 14, kind: output, shape index: {}]  }
   0x1   :  { %20 = vsyncpa [#allocation5], 0 }
   0x2   :  { %21 = vsyncpa [#allocation8], 0  ;;  %s4066_s29 = smov 0  }
   0x3 LB: > { %s3974_s30 = smov [#allocation4]   ;;  %s4072_s16 = sadd.s32 4294967295, %s3972_s29   ;;  %s3972_s29 = sphi %s4066_s29, %s27_s29  }
   0x4   : > { %s392_s15 = sshll.u32 %s3974_s30, 4  ;;  %p3633_p0 = scmp.ge.s32.totalorder %s3972_s29, 1  ;;  %s393_s15 = int_to_ptr.vmem [resolvable:$true] %s392_s15 }
   0x5   : > { %p357_p1 = scmp.lt.s32.totalorder %s3972_s29, 3  ;;  %p4760_p2 = scmp.eq.s32.totalorder %s4072_s16, 0 }
   0x6   : > { %s3975_s18 = smov [#allocation7]   ;;  %s3976_s20 = smov [#allocation2]  }
   0x7   : > { %p4077_p3 = pnand %p3633_p0, %p357_p1  ;;  %s423_s19 = sshll.u32 %s3975_s18, 4  ;;  %s424_s19 = int_to_ptr.vmem [resolvable:$true] %s423_s19 }
   0x8   : > { %s378_s21 = sshll.u32 %s3976_s20, 4  ;;  %s3977_s23 = smov [#allocation6]   ;;  %s4089_s21 = int_to_ptr.vmem [resolvable:$true] %s378_s21 }
   0x9   : > { %s4762_s17 = scalar_select %p4077_p3, 1, 0 }
   0xa   : > { %p3769_p4 = pneg %p4077_p3  ;;  %s4091_s24 = sshll.u32 %s3977_s23, 4  ;;  %s407_s24 = int_to_ptr.vmem [resolvable:$true] %s4091_s24 }
   0xb   : > { %s3835_s26 = scalar_lea.vmem %s393_s15, 128  ;;  %p3843_p10 = scmp.lt.s32.totalorder %s393_s15, %s393_s15 }
   0xc   : > { %p4085_p5 = pnand %p4760_p2, %p3769_p4  ;;  %p3836_p7 = scmp.ne.s32.totalorder %s393_s15, %s3835_s26 }
   0xd   : > { %p3844_p11 = scmp.lt.s32.totalorder %s3835_s26, %s3835_s26 }
   0xe   : > { %p4095_p6 = pneg %p4085_p5 }
   0xf   : > { %p3845_p12 = por %p3844_p11, %p3843_p10 }
  0x10   : > { %p3838_p8 = pnand %p3836_p7, %p4095_p6 }
  0x12   : > { %p3839_p9 = pneg %p3838_p8 }
  0x14   : > { %p3846_p13 = pnand %p3845_p12, %p3839_p9 }
  0x16   : > { %3849 = shalt.err (!%p3846_p13)
}
  0x17   : > { %3775 = dma.hbm_to_vmem [thread:$0]  (!%p4085_p5), %s4750_s5, 128, %s393_s15, [#allocation5]  }
  0x18   : > { %s3861_s30 = scalar_lea.vmem %s424_s19, 64  ;;  %p3869_p2 = scmp.lt.s32.totalorder %s424_s19, %s424_s19 }
  0x19   : > { %p3862_p0 = scmp.ne.s32.totalorder %s424_s19, %s3861_s30  ;;  %p3870_p7 = scmp.lt.s32.totalorder %s3861_s30, %s3861_s30 }
  0x1b   : > { %p3864_p1 = pnand %p3862_p0, %p4095_p6  ;;  %p3871_p8 = por %p3870_p7, %p3869_p2 }
  0x1d   : > { %p3865_p4 = pneg %p3864_p1 }
  0x1f   : > { %p3872_p3 = pnand %p3871_p8, %p3865_p4 }
  0x21   : > { %3875 = shalt.err (!%p3872_p3)
}
  0x22   : > { %3781 = dma.hbm_to_vmem [thread:$0]  (!%p4085_p5), %s4755_s10, 64, %s424_s19, [#allocation8]  }
  0x23   : > { %s3887_s15 = scalar_lea.vmem %s4089_s21, 1152  ;;  %p3895_p12 = scmp.lt.s32.totalorder %s4089_s21, %s4089_s21 }
  0x24   : > { %p3888_p9 = scmp.ne.s32.totalorder %s4089_s21, %s3887_s15  ;;  %p3896_p2 = scmp.lt.s32.totalorder %s3887_s15, %s3887_s15 }
  0x26   : > { %p3890_p10 = pnand %p3888_p9, %p4095_p6  ;;  %p3897_p13 = por %p3896_p2, %p3895_p12 }
  0x28   : > { %p3891_p11 = pneg %p3890_p10 }
  0x2a   : > { %p3898_p3 = pnand %p3897_p13, %p3891_p11 }
  0x2c   : > { %3901 = shalt.err (!%p3898_p3)
}
  0x2d   : > { %s3978_s23 = smov 128   ;;  %s3979_s26 = smov 8  }
  0x2e   : > { %3772 = dma.hbm_to_vmem [thread:$0]  (!%p4085_p5), %s4749_s4, 1152, %s4089_s21, [#allocation3], %s3978_s23, %s3978_s23, %s3979_s26  }
  0x2f   : > { %s3913_s28 = scalar_lea.vmem %s407_s24, 128  ;;  %p3921_p7 = scmp.lt.s32.totalorder %s407_s24, %s407_s24 }
  0x30   : > { %p3914_p0 = scmp.ne.s32.totalorder %s407_s24, %s3913_s28  ;;  %p3922_p8 = scmp.lt.s32.totalorder %s3913_s28, %s3913_s28 }
  0x32   : > { %p3916_p1 = pnand %p3914_p0, %p4095_p6  ;;  %p3923_p9 = por %p3922_p8, %p3921_p7 }
  0x34   : > { %p3917_p4 = pneg %p3916_p1 }
  0x36   : > { %p3924_p10 = pnand %p3923_p9, %p3917_p4 }
  0x38   : > { %3927 = shalt.err (!%p3924_p10)
}
  0x39   : > { %3778 = dma.hbm_to_vmem [thread:$0]  (!%p4085_p5), %s4752_s7, 128, %s407_s24, [#allocation5]  }
  0x3a   : > { %s3980_s20 = smov [#allocation9]  }
  0x3b   : > { %s434_s21 = sshll.u32 %s3980_s20, 4  ;;  %s435_s21 = int_to_ptr.vmem [resolvable:$true] %s434_s21 }
  0x3c   : > { %s3939_s15 = scalar_lea.vmem %s435_s21, 64  ;;  %p3947_p13 = scmp.lt.s32.totalorder %s435_s21, %s435_s21 }
  0x3d   : > { %p3940_p11 = scmp.ne.s32.totalorder %s435_s21, %s3939_s15  ;;  %p3948_p3 = scmp.lt.s32.totalorder %s3939_s15, %s3939_s15 }
  0x3f   : > { %p3942_p12 = pnand %p3940_p11, %p4095_p6  ;;  %p3949_p0 = por %p3948_p3, %p3947_p13 }
  0x41   : > { %p3943_p2 = pneg %p3942_p12 }
  0x43   : > { %p3950_p1 = pnand %p3949_p0, %p3943_p2 }
  0x45   : > { %3953 = shalt.err (!%p3950_p1)
}
  0x46   : > { %3784 = dma.hbm_to_vmem [thread:$0]  (!%p4085_p5), %s4756_s11, 64, %s435_s21, [#allocation8]  }
  0x47   : > { %p4765_p4 = scmp.ne.s32.totalorder %s4762_s17, 0 }
  0x48   : > { %p4766_p7 = scmp.eq.s32.totalorder (!%p4765_p4), %s4072_s16, 0 }
  0x49   : > { %461 = sbr.rel (%p4765_p4) target bundleno = 1239 (0x4d7), region = 76 }
  0x4e   : > { %3959 = dma.done.wait (%p4766_p7), [#allocation3], 1152   ;;  %p4767_p6 = pmov %p4766_p7 }
  0x50   : > { %3961 = vsyncadd (%p4767_p6), [#allocation3], 4294966144  ;;  %p4768_p8 = pmov %p4767_p6 }
  0x51   : > { %p4769_p9 = pmov %p4767_p6 }
  0x52   : > { %3963 = dma.done.wait (%p4768_p8), [#allocation5], 256  }
  0x53   : > { %3965 = vsyncadd (%p4769_p9), [#allocation5], 4294967040  ;;  %p4770_p10 = pmov %p4767_p6 }
  0x54   : > { %p4771_p5 = pmov %p4767_p6 }
  0x55   : > { %3967 = dma.done.wait (%p4770_p10), [#allocation8], 128  }
  0x56   : > { %3969 = vsyncadd (%p4771_p5), [#allocation8], 4294967168  ;;  %p523_p11 = scmp.lt.s32.totalorder %s4072_s16, 1  ;;  %v3981_v0 = vmov 0.0   ;;  %v3982_v1 = vmov 0   ;;  %vm605_vm0 = vcmask 1043456   ;;  %v701_v25 = vlaneseq }
  0x57   : > { %674 = vmatprep.mubr.f32.mxu0 %v3981_v0  ;;  %827 = vmatprep.mubr.f32.mxu1 %v3981_v0  ;;  %v549_v4 = vld [vmem:[%s4748_s3] sm:$0xff]  ;;  %vm598_vm1 = vcmask 31744   ;;  %v550_v6 = vld [vmem:[%s4748_s3 + $0x8] sm:$0xf]  ;;  %s3983_s23 = smov 17   ;;  %s3984_s26 = smov 16  }
  0x58   : > { %s4773_s16 = smov (!%p523_p11, %s4072_s16), 1  ;;  %3820 = vset.pattern.permute.xlu0 %v3982_v1  ;;  %3821 = vset.pattern.permute.xlu1 %v3982_v1  ;;  %v547_v5 = vld [vmem:[%s4747_s2] sm:$0xff]  ;;  %v548_v7 = vld [vmem:[%s4747_s2 + $0x8] sm:$0xf]  ;;  %s3985_s22 = smov 15   ;;  %v4269_v26 = vshrl.u32 %v701_v25, 7 }
  0x59   : > { %s3747_s17 = sshll.u32 %s4773_s16, 3  ;;  %588 = vperm.xlu0 %3820, %v549_v4   ;;  %s3986_s24 = smov 1   ;;  %v570_v24 = vld [vmem:[#allocation6] sm:$0x3f]  ;;  %v4274_v27 = vld [vmem:[%s4746_s1] sm:$0xff]  ;;  %v4283_v33 = vand.u32 127, %v701_v25 }
  0x5a   : > { %s4166_s25 = scalar_lea.vmem %s4745_s0, %s3747_s17  ;;  %s3987_s27 = smov 127   ;;  %v3650_v28 = vrot.slane %v4274_v27, 10  ;;  %v709_v29 = vsub.s32 0, %v4269_v26  ;;  %v713_v30 = vsub.s32 4, %v4269_v26  ;;  %v3651_v31 = vrot.slane %v4274_v27, 11 }
  0x5b   : > { %v585_v2 = vld [vmem:[%s4166_s25] sm:$0xff]  ;;  %s3988_s19 = smov 113   ;;  %s3989_s28 = smov 112   ;;  %vm731_vm2 = vcmp.lt.s32.totalorder %v4283_v33, 16  ;;  %vm703_vm3 = vcmp.lt.s32.totalorder %v4283_v33, 17  ;;  %v1033_v46 = vsub.s32 2, %v4269_v26 }
  0x5c   : > { %v597_v3 = vcombine.high %v585_v2, %v585_v2  ;;  %s3990_s30 = smov 111   ;;  %v4281_v32 = vmul.f32 %v3650_v28, %v4274_v27  ;;  %v737_v34 = vrot.slane %v4274_v27, %v709_v29  ;;  %v741_v35 = vrot.slane %v4274_v27, %v713_v30  ;;  %v552_v55 = vld [vmem:[#allocation2 + $0x8] sm:$0x3f] }
  0x5d   : > { %593 = vperm.xlu0 %3820, %v550_v6   ;;  %v542_v38 = vmul.f32 %v3651_v31, %v4274_v27  ;;  %v1037_v54 = vsub.s32 6, %v4269_v26  ;;  %vm918_vm4 = vcmp.lt.s32.totalorder %v4283_v33, 15  ;;  %v1034_v59 = vrot.slane %v4274_v27, %v1033_v46  ;;  %v551_v6 = vld [vmem:[#allocation2] sm:$0x3f] }
  0x5e   : > { %3653 = vmatprep.subr.msk.mxu0 %vm605_vm0, %v597_v3  ;;  %v710_v39 = vrot.slane %v4281_v32, %v709_v29  ;;  %v714_v40 = vrot.slane %v4281_v32, %v713_v30  ;;  %v4291_v41 = vrot.slane %v737_v34, %v709_v29  ;;  %v4293_v42 = vrot.slane %v741_v35, %v709_v29 }
  0x5f   : > { %3654 = vmatpush1.msk.msra.mxu0 %vm605_vm0, %v585_v2  ;;  %v925_v45 = vrot.slane %v542_v38, %v709_v29  ;;  %v929_v53 = vrot.slane %v542_v38, %v713_v30  ;;  %v3652_v60 = vrot.slane %v4274_v27, 9  ;;  %v1222_v63 = vsub.s32 3, %v4269_v26  ;;  %v553_v30 = vld [vmem:[#allocation2 + $0x10] sm:$0x3f] }
  0x60   : > { %3655 = vmatmul.mubr.msk.f32.vlgmr.msra.gmra.mxu0 %vm598_vm1, %v547_v5  ;;  %v4301_v49 = vrot.slane %v710_v39, %v709_v29  ;;  %v4303_v50 = vrot.slane %v714_v40, %v709_v29  ;;  %v1226_v1 = vsub.s32 7, %v4269_v26  ;;  %v1038_v5 = vrot.slane %v4274_v27, %v1037_v54 }
  0x61   : > { %680 = vmatprep.mubr.f32.mxu0 %v3981_v0  ;;  %v4310_v58 = vrot.slane %v925_v45, %v709_v29  ;;  %v4323_v4 = vrot.slane %v929_v53, %v709_v29  ;;  %vm1028_vm5 = vcmp.lt.s32.totalorder %v4283_v33, 1  ;;  %v4349_v29 = vsub.s32 5, %v4269_v26  ;;  %v555_v45 = vld [vmem:[#allocation2 + $0x20] sm:$0x3f] }
  0x62   : > { %v4345_v28 = vrot.slane %v1038_v5, %v1033_v46  ;;  %vm1217_vm6 = vcmp.lt.s32.totalorder %v4283_v33, 127  ;;  %vm1326_vm7 = vcmp.lt.s32.totalorder %v4283_v33, 113  ;;  %vm1436_vm8 = vcmp.lt.s32.totalorder %v4283_v33, 112  ;;  %v557_v5 = vld [vmem:[#allocation2 + $0x30] sm:$0x3f] }
  0x63   : > { %vm1545_vm9 = vcmp.lt.s32.totalorder %v4283_v33, 111  ;;  %vm2486_vm10 = vcmask 1045504   ;;  %vm2482_vm11 = vcmask 48128   ;;  %vm3433_vm12 = vcmask 64512  }
  0x64   : > { %3656 = vmatmul.mubr.msk.f32.gmra.mxu0 %vm598_vm1, %v548_v7 }
  0x65   : > { %1015 = vmatprep.mubr.f32.mxu0 %v3981_v0 }
  0xd4   : > { %v589_v8 = vpop.permute.xlu0 %588 }
  0xd8   : > { %v594_v18 = vpop.permute.xlu0 %593 }
 0x120   : > { %v676_v9 = vpop.f32.mrf.mxu0 }
 0x121   : > { %v4187_v10 = vadd.f32 %v676_v9, %v589_v8  ;;  %v4330_v9 = vrot.slane %v1034_v59, %v1033_v46 }
 0x122   : > { %v678_v11 = vpop.f32.mrf.mxu0 }
 0x123   : > { %v687_v12 = vmax.f32 %v4187_v10, 0.0  ;;  %v4190_v13 = vadd.f32 %v678_v11, %v589_v8  ;;  %v4333_v11 = vsub.s32 1, %v4269_v26 }
 0x124   : > { %v682_v17 = vpop.f32.mrf.mxu0 }
 0x125   : > { %v4194_v14 = vrot.slane %v687_v12, 4  ;;  %v688_v15 = vmax.f32 %v4190_v13, 0.0  ;;  %v683_v19 = vadd.f32 %v682_v17, %v594_v18  ;;  %v546_v17 = vmul.f32 %v3652_v60, %v4274_v27  ;;  %v582_v13 = vld [vmem:[#allocation9] sm:$0xf] }
 0x126   : > { %v684_v21 = vpop.f32.mrf.mxu0 }
 0x127   : > { %697 = vrot.lane.b32.xlu0 %v4194_v14, %s3983_s23  ;;  %727 = vrot.lane.b32.xlu1 %v4194_v14, %s3984_s26  ;;  %v4203_v16 = vrot.slane %v688_v15, 4  ;;  %v4229_v20 = vmax.f32 %v683_v19, 0.0  ;;  %v685_v22 = vadd.f32 %v684_v21, %v594_v18  ;;  %v1223_v21 = vrot.slane %v4274_v27, %v1222_v63 }
 0x128   : > { %v1333_v35 = vrot.slane %v546_v17, %v4333_v11 }
 0x129   : > { %v4239_v23 = vmax.f32 %v685_v22, 0.0  ;;  %v1227_v22 = vrot.slane %v4274_v27, %v1226_v1  ;;  %v4359_v38 = vrot.slane %v1223_v21, %v1222_v63 }
 0x12b   : > { %914 = vrot.lane.b32.xlu0 %v4194_v14, %s3985_s22  ;;  %729 = vrot.lane.b32.xlu1 %v4203_v16, %s3984_s26  ;;  %v4361_v26 = vrot.slane %v1227_v22, %v1222_v63  ;;  %v558_v22 = vld [vmem:[#allocation2 + $0x38] sm:$0x3f] }
 0x12f   : > { %1024 = vrot.lane.b32.xlu0 %v4194_v14, %s3986_s24  ;;  %699 = vrot.lane.b32.xlu1 %v4203_v16, %s3983_s23 }
 0x133   : > { %1213 = vrot.lane.b32.xlu0 %v4194_v14, %s3987_s27  ;;  %916 = vrot.lane.b32.xlu1 %v4203_v16, %s3985_s22 }
 0x137   : > { %1322 = vrot.lane.b32.xlu0 %v4194_v14, %s3988_s19  ;;  %1026 = vrot.lane.b32.xlu1 %v4203_v16, %s3986_s24 }
 0x13b   : > { %1432 = vrot.lane.b32.xlu0 %v4194_v14, %s3989_s28  ;;  %1215 = vrot.lane.b32.xlu1 %v4203_v16, %s3987_s27 }
 0x13f   : > { %1541 = vrot.lane.b32.xlu0 %v4194_v14, %s3990_s30  ;;  %1324 = vrot.lane.b32.xlu1 %v4203_v16, %s3988_s19 }
 0x143   : > { %1667 = vrot.lane.b32.xlu0 %v4229_v20, %s3984_s26  ;;  %1434 = vrot.lane.b32.xlu1 %v4203_v16, %s3989_s28 }
 0x147   : > { %1659 = vrot.lane.b32.xlu0 %v4229_v20, %s3983_s23  ;;  %1543 = vrot.lane.b32.xlu1 %v4203_v16, %s3990_s30 }
 0x14b   : > { %1835 = vrot.lane.b32.xlu0 %v4229_v20, %s3985_s22  ;;  %1669 = vrot.lane.b32.xlu1 %v4239_v23, %s3984_s26 }
 0x14f   : > { %1925 = vrot.lane.b32.xlu0 %v4229_v20, %s3986_s24  ;;  %1661 = vrot.lane.b32.xlu1 %v4239_v23, %s3983_s23 }
 0x153   : > { %2097 = vrot.lane.b32.xlu0 %v4229_v20, %s3987_s27  ;;  %1837 = vrot.lane.b32.xlu1 %v4239_v23, %s3985_s22 }
 0x157   : > { %2187 = vrot.lane.b32.xlu0 %v4229_v20, %s3988_s19  ;;  %1927 = vrot.lane.b32.xlu1 %v4239_v23, %s3986_s24 }
 0x15b   : > { %2277 = vrot.lane.b32.xlu0 %v4229_v20, %s3989_s28  ;;  %2099 = vrot.lane.b32.xlu1 %v4239_v23, %s3987_s27 }
 0x15f   : > { %2367 = vrot.lane.b32.xlu0 %v4229_v20, %s3990_s30  ;;  %2189 = vrot.lane.b32.xlu1 %v4239_v23, %s3988_s19 }
 0x163   : > { %2459 = vperm.xlu0 %3820, %v570_v24   ;;  %2279 = vrot.lane.b32.xlu1 %v4239_v23, %s3989_s28 }
 0x167   : > { %2369 = vrot.lane.b32.xlu1 %v4239_v23, %s3990_s30 }
 0x199   : > { %v698_v36 = vpop.permute.xlu0 %697  ;;  %v728_v37 = vpop.permute.xlu1 %727 }
 0x19d   : > { %v915_v43 = vpop.permute.xlu0 %914  ;;  %v730_v44 = vpop.permute.xlu1 %729 }
 0x19e   : > { %v732_v47 = vsel %vm731_vm2, %v728_v37, %v730_v44  ;;  %v733_v48 = vsel %vm731_vm2, %v730_v44, %v728_v37  ;;  %v554_v44 = vld [vmem:[#allocation2 + $0x18] sm:$0x3f] }
 0x19f   : > { %v752_v51 = vmul.f32 %v4291_v41, %v733_v48  ;;  %v753_v52 = vmul.f32 %v4293_v42, %v732_v47  ;;  %v4375_v48 = vrot.slane %v1333_v35, %v4333_v11 }
 0x1a1   : > { %v1025_v56 = vpop.permute.xlu0 %1024  ;;  %v700_v57 = vpop.permute.xlu1 %699  ;;  %3657 = vmatprep.subr.msk.mxu1 %vm605_vm0, %v753_v52  ;;  %v1446_v52 = vrot.slane %v4274_v27, %v4349_v29 }
 0x1a2   : > { %v704_v61 = vsel %vm703_vm3, %v698_v36, %v700_v57  ;;  %v705_v62 = vsel %vm703_vm3, %v700_v57, %v698_v36  ;;  %3658 = vmatpush1.msk.msra.mxu1 %vm605_vm0, %v752_v51 }
 0x1a3   : > { %v725_v2 = vmul.f32 %v4301_v49, %v705_v62  ;;  %v726_v3 = vmul.f32 %v4303_v50, %v704_v61  ;;  %3659 = vmatmul.mubr.msk.f32.vlgmr.msra.gmra.mxu1 %vm598_vm1, %v552_v55  ;;  %v4407_v62 = vrot.slane %v1446_v52, %v4333_v11  ;;  %v561_v52 = vld [vmem:[%s4751_s6] sm:$0x3f] }
 0x1a4   : > { %907 = vmatprep.mubr.f32.mxu1 %v3981_v0 }
 0x1a5   : > { %v1214_v7 = vpop.permute.xlu0 %1213  ;;  %v917_v8 = vpop.permute.xlu1 %916  ;;  %3660 = vmatprep.subr.msk.mxu1 %vm605_vm0, %v726_v3  ;;  %v1555_v3 = vrot.slane %v4281_v32, %v4349_v29 }
 0x1a6   : > { %v919_v18 = vsel %vm918_vm4, %v915_v43, %v917_v8  ;;  %v920_v19 = vsel %vm918_vm4, %v917_v8, %v915_v43  ;;  %3661 = vmatpush1.msk.msra.mxu1 %vm605_vm0, %v725_v2  ;;  %v1337_v43 = vrot.slane %v546_v17, %v4349_v29  ;;  %v1551_v2 = vrot.slane %v4281_v32, %v4333_v11 }
 0x1a7   : > { %v940_v24 = vmul.f32 %v4310_v58, %v920_v19  ;;  %v941_v25 = vmul.f32 %v4323_v4, %v919_v18  ;;  %3662 = vmatmul.mubr.msk.f32.vlgmr.msra.gmra.mxu1 %vm598_vm1, %v551_v6  ;;  %v4430_v21 = vrot.slane %v1555_v3, %v4333_v11 }
 0x1a8   : > { %1124 = vmatprep.mubr.f32.mxu1 %v3981_v0  ;;  %v4390_v55 = vrot.slane %v1337_v43, %v4333_v11  ;;  %v4427_v19 = vrot.slane %v1551_v2, %v4333_v11 }
 0x1a9   : > { %v1323_v31 = vpop.permute.xlu0 %1322  ;;  %v1027_v34 = vpop.permute.xlu1 %1026  ;;  %3663 = vmatprep.subr.msk.mxu0 %vm605_vm0, %v941_v25 }
 0x1aa   : > { %v1029_v36 = vsel %vm1028_vm5, %v1025_v56, %v1027_v34  ;;  %v1030_v37 = vsel %vm1028_vm5, %v1027_v34, %v1025_v56  ;;  %3664 = vmatpush1.msk.msra.mxu0 %vm605_vm0, %v940_v24  ;;  %v556_v56 = vld [vmem:[#allocation2 + $0x28] sm:$0x3f]  ;;  %v559_v34 = vld [vmem:[#allocation2 + $0x40] sm:$0x3f] }
 0x1ab   : > { %v1049_v39 = vmul.f32 %v4330_v9, %v1030_v37  ;;  %v1050_v40 = vmul.f32 %v4345_v28, %v1029_v36  ;;  %3669 = vmatprep.subr.msk.mxu0 %vm605_vm0, %v4203_v16  ;;  %3665 = vmatmul.mubr.msk.f32.vlgmr.msra.gmra.mxu0 %vm598_vm1, %v553_v30 }
 0x1ac   : > { %3670 = vmatpush1.msk.msra.mxu0 %vm605_vm0, %v4194_v14  ;;  %1204 = vmatprep.mubr.f32.mxu0 %v3981_v0  ;;  %v1442_v14 = vrot.slane %v4274_v27, %v4333_v11 }
 0x1ad   : > { %v1433_v46 = vpop.permute.xlu0 %1432  ;;  %v1216_v47 = vpop.permute.xlu1 %1215  ;;  %3666 = vmatprep.subr.msk.mxu1 %vm605_vm0, %v1050_v40 }
 0x1ae   : > { %v1218_v16 = vsel %vm1217_vm6, %v1214_v7, %v1216_v47  ;;  %v1219_v51 = vsel %vm1217_vm6, %v1216_v47, %v1214_v7  ;;  %3667 = vmatpush1.msk.msra.mxu1 %vm605_vm0, %v1049_v39  ;;  %v4404_v61 = vrot.slane %v1442_v14, %v4333_v11 }
 0x1af   : > { %v1238_v53 = vmul.f32 %v4359_v38, %v1218_v16  ;;  %v1239_v54 = vmul.f32 %v4361_v26, %v1219_v51  ;;  %3668 = vmatmul.mubr.msk.f32.vlgmr.msra.gmra.mxu1 %vm598_vm1, %v554_v44  ;;  %3671 = vmatmul.mubr.msk.f32.vlgmr.msra.gmra.mxu0 %vm598_vm1, %v555_v45  ;;  %v562_v44 = vld [vmem:[%s4751_s6 + $0x8] sm:$0x3f] }
 0x1b0   : > { %1313 = vmatprep.mubr.f32.mxu1 %v3981_v0  ;;  %1423 = vmatprep.mubr.f32.mxu0 %v3981_v0 }
 0x1b1   : > { %v1542_v57 = vpop.permute.xlu0 %1541  ;;  %v1325_v27 = vpop.permute.xlu1 %1324  ;;  %3672 = vmatprep.subr.msk.mxu1 %vm605_vm0, %v1239_v54 }
 0x1b2   : > { %v1327_v59 = vsel %vm1326_vm7, %v1323_v31, %v1325_v27  ;;  %v1328_v60 = vsel %vm1326_vm7, %v1325_v27, %v1323_v31  ;;  %3673 = vmatpush1.msk.msra.mxu1 %vm605_vm0, %v1238_v53 }
 0x1b3   : > { %v1348_v63 = vmul.f32 %v4375_v48, %v1327_v59  ;;  %v1349_v1 = vmul.f32 %v4390_v55, %v1328_v60  ;;  %3674 = vmatmul.mubr.msk.f32.vlgmr.msra.gmra.mxu1 %vm598_vm1, %v556_v56  ;;  %v563_v60 = vld [vmem:[%s4751_s6 + $0x10] sm:$0x3f] }
 0x1b4   : > { %1532 = vmatprep.mubr.f32.mxu1 %v3981_v0 }
 0x1b5   : > { %v1668_v6 = vpop.permute.xlu0 %1667  ;;  %v1435_v7 = vpop.permute.xlu1 %1434  ;;  %3675 = vmatprep.subr.msk.mxu0 %vm605_vm0, %v1349_v1 }
 0x1b6   : > { %v1437_v8 = vsel %vm1436_vm8, %v1433_v46, %v1435_v7  ;;  %v1438_v17 = vsel %vm1436_vm8, %v1435_v7, %v1433_v46  ;;  %3676 = vmatpush1.msk.msra.mxu0 %vm605_vm0, %v1348_v63  ;;  %v565_v7 = vld [vmem:[%s4751_s6 + $0x20] sm:$0x3f] }
 0x1b7   : > { %v1457_v32 = vmul.f32 %v4404_v61, %v1437_v8  ;;  %v1458_v18 = vmul.f32 %v4407_v62, %v1438_v17  ;;  %3677 = vmatmul.mubr.msk.f32.vlgmr.msra.gmra.mxu0 %vm598_vm1, %v557_v5 }
 0x1b8   : > { %1641 = vmatprep.mubr.f32.mxu0 %v3981_v0 }
 0x1b9   : > { %v1660_v24 = vpop.permute.xlu0 %1659  ;;  %v1544_v25 = vpop.permute.xlu1 %1543  ;;  %3678 = vmatprep.subr.msk.mxu1 %vm605_vm0, %v1458_v18 }
 0x1ba   : > { %v1546_v29 = vsel %vm1545_vm9, %v1542_v57, %v1544_v25  ;;  %v1547_v30 = vsel %vm1545_vm9, %v1544_v25, %v1542_v57  ;;  %3679 = vmatpush1.msk.msra.mxu1 %vm605_vm0, %v1457_v32 }
 0x1bb   : > { %v1566_v11 = vmul.f32 %v4427_v19, %v1546_v29  ;;  %v1567_v31 = vmul.f32 %v4430_v21, %v1547_v30  ;;  %3680 = vmatmul.mubr.msk.f32.vlgmr.msra.gmra.mxu1 %vm598_vm1, %v558_v22  ;;  %v566_v22 = vld [vmem:[%s4751_s6 + $0x28] sm:$0x3f] }
 0x1bc   : > { %1748 = vmatprep.mubr.f32.mxu1 %v3981_v0 }
 0x1bd   : > { %v1836_v35 = vpop.permute.xlu0 %1835  ;;  %v1670_v36 = vpop.permute.xlu1 %1669  ;;  %3681 = vmatprep.subr.msk.mxu0 %vm605_vm0, %v1567_v31 }
 0x1be   : > { %v1671_v37 = vsel %vm731_vm2, %v1668_v6, %v1670_v36  ;;  %v1672_v39 = vsel %vm731_vm2, %v1670_v36, %v1668_v6  ;;  %3682 = vmatpush1.msk.msra.mxu0 %vm605_vm0, %v1566_v11  ;;  %v564_v6 = vld [vmem:[%s4751_s6 + $0x18] sm:$0x3f] }
 0x1bf   : > { %v1673_v40 = vmul.f32 %v1672_v39, %v4291_v41  ;;  %v1674_v43 = vmul.f32 %v1671_v37, %v4293_v42  ;;  %3683 = vmatmul.mubr.msk.f32.vlgmr.msra.gmra.mxu0 %vm598_vm1, %v559_v34  ;;  %v567_v34 = vld [vmem:[%s4751_s6 + $0x30] sm:$0x3f] }
 0x1c0   : > { %1828 = vmatprep.mubr.f32.mxu0 %v3981_v0 }
 0x1c1   : > { %v1926_v45 = vpop.permute.xlu0 %1925  ;;  %v1662_v46 = vpop.permute.xlu1 %1661  ;;  %3684 = vmatprep.subr.msk.mxu1 %vm605_vm0, %v1674_v43  ;;  %v568_v43 = vld [vmem:[%s4751_s6 + $0x38] sm:$0x3f] }
 0x1c2   : > { %v1663_v47 = vsel %vm703_vm3, %v1660_v24, %v1662_v46  ;;  %v1664_v16 = vsel %vm703_vm3, %v1662_v46, %v1660_v24  ;;  %3685 = vmatpush1.msk.msra.mxu1 %vm605_vm0, %v1673_v40 }
 0x1c3   : > { %v1665_v51 = vmul.f32 %v1664_v16, %v4301_v49  ;;  %v1666_v14 = vmul.f32 %v1663_v47, %v4303_v50  ;;  %3686 = vmatmul.mubr.msk.f32.vlgmr.msra.gmra.mxu1 %vm598_vm1, %v562_v44 }
 0x1c4   : > { %1916 = vmatprep.mubr.f32.mxu1 %v3981_v0 }
 0x1c5   : > { %v1838_v53 = vpop.permute.xlu1 %1837  ;;  %3687 = vmatprep.subr.msk.mxu0 %vm605_vm0, %v1666_v14  ;;  %v2098_v57 = vpop.permute.xlu0 %2097  ;;  %v569_v14 = vld [vmem:[%s4751_s6 + $0x40] sm:$0x3f] }
 0x1c6   : > { %v1839_v54 = vsel %vm918_vm4, %v1836_v35, %v1838_v53  ;;  %v1840_v56 = vsel %vm918_vm4, %v1838_v53, %v1836_v35  ;;  %3688 = vmatpush1.msk.msra.mxu0 %vm605_vm0, %v1665_v51 }
 0x1c7   : > { %v1841_v27 = vmul.f32 %v1840_v56, %v4310_v58  ;;  %v1842_v59 = vmul.f32 %v1839_v54, %v4323_v4  ;;  %3689 = vmatmul.mubr.msk.f32.vlgmr.msra.gmra.mxu0 %vm598_vm1, %v561_v52 }
 0x1c8   : > { %2006 = vmatprep.mubr.f32.mxu0 %v3981_v0 }
 0x1c9   : > { %v1928_v63 = vpop.permute.xlu1 %1927  ;;  %3690 = vmatprep.subr.msk.mxu1 %vm605_vm0, %v1842_v59  ;;  %v2188_v8 = vpop.permute.xlu0 %2187 }
 0x1ca   : > { %v1929_v1 = vsel %vm1028_vm5, %v1926_v45, %v1928_v63  ;;  %v1930_v2 = vsel %vm1028_vm5, %v1928_v63, %v1926_v45  ;;  %3691 = vmatpush1.msk.msra.mxu1 %vm605_vm0, %v1841_v27 }
 0x1cb   : > { %v1931_v3 = vmul.f32 %v1930_v2, %v4330_v9  ;;  %v1932_v5 = vmul.f32 %v1929_v1, %v4345_v28  ;;  %3696 = vmatprep.subr.msk.mxu1 %vm605_vm0, %v4239_v23  ;;  %3692 = vmatmul.mubr.msk.f32.vlgmr.msra.gmra.mxu1 %vm598_vm1, %v563_v60 }
 0x1cc   : > { %3697 = vmatpush1.msk.msra.mxu1 %vm605_vm0, %v4229_v20  ;;  %2088 = vmatprep.mubr.f32.mxu1 %v3981_v0 }
 0x1cd   : > { %v2100_v17 = vpop.permute.xlu1 %2099  ;;  %3693 = vmatprep.subr.msk.mxu0 %vm605_vm0, %v1932_v5  ;;  %v2278_v30 = vpop.permute.xlu0 %2277 }
 0x1ce   : > { %v2101_v23 = vsel %vm1217_vm6, %v2098_v57, %v2100_v17  ;;  %v2102_v20 = vsel %vm1217_vm6, %v2100_v17, %v2098_v57  ;;  %3694 = vmatpush1.msk.msra.mxu0 %vm605_vm0, %v1931_v3 }
 0x1cf   : > { %v2103_v32 = vmul.f32 %v2101_v23, %v4359_v38  ;;  %v2104_v18 = vmul.f32 %v2102_v20, %v4361_v26  ;;  %3695 = vmatmul.mubr.msk.f32.vlgmr.msra.gmra.mxu0 %vm598_vm1, %v564_v6  ;;  %3698 = vmatmul.mubr.msk.f32.vlgmr.msra.gmra.mxu1 %vm598_vm1, %v565_v7 }
 0x1d0   : > { %2178 = vmatprep.mubr.f32.mxu0 %v3981_v0  ;;  %2268 = vmatprep.mubr.f32.mxu1 %v3981_v0 }
 0x1d1   : > { %v2190_v24 = vpop.permute.xlu1 %2189  ;;  %3699 = vmatprep.subr.msk.mxu0 %vm605_vm0, %v2104_v18  ;;  %v2368_v44 = vpop.permute.xlu0 %2367 }
 0x1d2   : > { %v2191_v25 = vsel %vm1326_vm7, %v2188_v8, %v2190_v24  ;;  %v2192_v29 = vsel %vm1326_vm7, %v2190_v24, %v2188_v8  ;;  %3700 = vmatpush1.msk.msra.mxu0 %vm605_vm0, %v2103_v32 }
 0x1d3   : > { %v2193_v11 = vmul.f32 %v2191_v25, %v4375_v48  ;;  %v2194_v31 = vmul.f32 %v2192_v29, %v4390_v55  ;;  %3701 = vmatmul.mubr.msk.f32.vlgmr.msra.gmra.mxu0 %vm598_vm1, %v566_v22 }
 0x1d4   : > { %2358 = vmatprep.mubr.f32.mxu0 %v3981_v0 }
 0x1d5   : > { %v2280_v35 = vpop.permute.xlu1 %2279  ;;  %3702 = vmatprep.subr.msk.mxu1 %vm605_vm0, %v2194_v31 }
 0x1d6   : > { %v2281_v36 = vsel %vm1436_vm8, %v2278_v30, %v2280_v35  ;;  %v2282_v37 = vsel %vm1436_vm8, %v2280_v35, %v2278_v30  ;;  %3703 = vmatpush1.msk.msra.mxu1 %vm605_vm0, %v2193_v11 }
 0x1d7   : > { %v2283_v39 = vmul.f32 %v2281_v36, %v4404_v61  ;;  %v2284_v40 = vmul.f32 %v2282_v37, %v4407_v62  ;;  %3704 = vmatmul.mubr.msk.f32.vlgmr.msra.gmra.mxu1 %vm598_vm1, %v567_v34 }
 0x1d8   : > { %2448 = vmatprep.mubr.f32.mxu1 %v3981_v0 }
 0x1d9   : > { %v2370_v45 = vpop.permute.xlu1 %2369  ;;  %3705 = vmatprep.subr.msk.mxu0 %vm605_vm0, %v2284_v40 }
 0x1da   : > { %v2371_v46 = vsel %vm1545_vm9, %v2368_v44, %v2370_v45  ;;  %v2372_v47 = vsel %vm1545_vm9, %v2370_v45, %v2368_v44  ;;  %3706 = vmatpush1.msk.msra.mxu0 %vm605_vm0, %v2283_v39 }
 0x1db   : > { %v2373_v16 = vmul.f32 %v2371_v46, %v4427_v19  ;;  %v2374_v51 = vmul.f32 %v2372_v47, %v4430_v21  ;;  %3707 = vmatmul.mubr.msk.f32.vlgmr.msra.gmra.mxu0 %vm598_vm1, %v568_v43 }
 0x1dc   : > { %2557 = vmatprep.mubr.f32.mxu0 %v3981_v0 }
 0x1dd   : > { %3708 = vmatprep.subr.msk.mxu1 %vm605_vm0, %v2374_v51 }
 0x1de   : > { %3709 = vmatpush1.msk.msra.mxu1 %vm605_vm0, %v2373_v16 }
 0x1df   : > { %3710 = vmatmul.mubr.msk.f32.vlgmr.msra.gmra.mxu1 %vm598_vm1, %v569_v14 }
 0x1e0   : > { %2637 = vmatprep.mubr.f32.mxu1 %v3981_v0 }
 0x263   : > { %v829_v52 = vpop.f32.mrf.mxu1 }
 0x265   : > { %v831_v53 = vpop.f32.mrf.mxu1 }
 0x267   : > { %v909_v54 = vpop.f32.mrf.mxu1 }
 0x268   : > { %v910_v56 = vadd.f32 %v909_v54, %v829_v52 }
 0x269   : > { %v911_v57 = vpop.f32.mrf.mxu1 }
 0x26a   : > { %v912_v27 = vadd.f32 %v911_v57, %v831_v53 }
 0x26b   : > { %v1017_v59 = vpop.f32.mrf.mxu0 }
 0x26c   : > { %v1022_v60 = vadd.f32 %v1017_v59, %v910_v56 }
 0x26d   : > { %v1019_v63 = vpop.f32.mrf.mxu0 }
 0x26e   : > { %v1023_v1 = vadd.f32 %v1019_v63, %v912_v27 }
 0x26f   : > { %v1126_v2 = vpop.f32.mrf.mxu1  ;;  %v1206_v3 = vpop.f32.mrf.mxu0 }
 0x270   : > { %v1131_v5 = vadd.f32 %v1126_v2, %v1022_v60 }
 0x271   : > { %v1128_v6 = vpop.f32.mrf.mxu1  ;;  %v1208_v7 = vpop.f32.mrf.mxu0 }
 0x272   : > { %v1132_v8 = vadd.f32 %v1128_v6, %v1023_v1  ;;  %v1211_v17 = vadd.f32 %v1206_v3, %v1131_v5 }
 0x273   : > { %v1315_v23 = vpop.f32.mrf.mxu1 }
 0x274   : > { %v1212_v20 = vadd.f32 %v1208_v7, %v1132_v8  ;;  %v1320_v32 = vadd.f32 %v1315_v23, %v1211_v17 }
 0x275   : > { %v1317_v18 = vpop.f32.mrf.mxu1 }
 0x276   : > { %v1321_v22 = vadd.f32 %v1317_v18, %v1212_v20 }
 0x277   : > { %v1425_v24 = vpop.f32.mrf.mxu0 }
 0x278   : > { %v1430_v25 = vadd.f32 %v1425_v24, %v1320_v32 }
 0x279   : > { %v1427_v29 = vpop.f32.mrf.mxu0 }
 0x27a   : > { %v1431_v30 = vadd.f32 %v1427_v29, %v1321_v22  ;;  %v2460_v29 = vpop.permute.xlu0 %2459 }
 0x27b   : > { %v1534_v11 = vpop.f32.mrf.mxu1 }
 0x27c   : > { %v1539_v31 = vadd.f32 %v1534_v11, %v1430_v25 }
 0x27d   : > { %v1536_v34 = vpop.f32.mrf.mxu1 }
 0x27e   : > { %v1540_v35 = vadd.f32 %v1536_v34, %v1431_v30 }
 0x27f   : > { %v1643_v36 = vpop.f32.mrf.mxu0 }
 0x280   : > { %v4561_v37 = vadd.f32 %v1643_v36, %v1539_v31 }
 0x281   : > { %v1645_v39 = vpop.f32.mrf.mxu0 }
 0x282   : > { %v4563_v40 = vadd.f32 %v1645_v39, %v1540_v35  ;;  %v560_v39 = vld [vmem:[#allocation4] sm:$0x3f] }
 0x283   : > { %v1750_v43 = vpop.f32.mrf.mxu1 }
 0x285   : > { %v1752_v44 = vpop.f32.mrf.mxu1 }
 0x287   : > { %v1830_v45 = vpop.f32.mrf.mxu0 }
 0x288   : > { %v1831_v46 = vadd.f32 %v1830_v45, %v1750_v43  ;;  %v580_v43 = vld [vmem:[%s4754_s9] sm:$0xff] }
 0x289   : > { %v1832_v47 = vpop.f32.mrf.mxu0 }
 0x28a   : > { %v1833_v16 = vadd.f32 %v1832_v47, %v1752_v44  ;;  %v584_v44 = vld [vmem:[%s4758_s13] sm:$0xf] }
 0x28b   : > { %v1918_v51 = vpop.f32.mrf.mxu1 }
 0x28c   : > { %v1923_v14 = vadd.f32 %v1918_v51, %v1831_v46 }
 0x28d   : > { %v1920_v52 = vpop.f32.mrf.mxu1 }
 0x28e   : > { %v1924_v53 = vadd.f32 %v1920_v52, %v1833_v16 }
 0x28f   : > { %v2008_v54 = vpop.f32.mrf.mxu0  ;;  %v2090_v56 = vpop.f32.mrf.mxu1 }
 0x290   : > { %v2013_v57 = vadd.f32 %v2008_v54, %v1923_v14 }
 0x291   : > { %v2010_v27 = vpop.f32.mrf.mxu0  ;;  %v2092_v63 = vpop.f32.mrf.mxu1 }
 0x292   : > { %v2014_v59 = vadd.f32 %v2010_v27, %v1924_v53  ;;  %v2095_v60 = vadd.f32 %v2090_v56, %v2013_v57  ;;  %v572_v53 = vld [vmem:[%s4753_s8 + $0x8] sm:$0xff] }
 0x293   : > { %v2180_v1 = vpop.f32.mrf.mxu0 }
 0x294   : > { %v2096_v2 = vadd.f32 %v2092_v63, %v2014_v59  ;;  %v2185_v3 = vadd.f32 %v2180_v1, %v2095_v60  ;;  %v571_v59 = vld [vmem:[%s4753_s8] sm:$0xff] }
 0x295   : > { %v2182_v5 = vpop.f32.mrf.mxu0 }
 0x296   : > { %v2186_v7 = vadd.f32 %v2182_v5, %v2096_v2 }
 0x297   : > { %v2270_v6 = vpop.f32.mrf.mxu1 }
 0x298   : > { %v2275_v8 = vadd.f32 %v2270_v6, %v2185_v3  ;;  %v573_v3 = vld [vmem:[%s4753_s8 + $0x10] sm:$0xff] }
 0x299   : > { %v2272_v17 = vpop.f32.mrf.mxu1 }
 0x29a   : > { %v2276_v32 = vadd.f32 %v2272_v17, %v2186_v7  ;;  %v574_v17 = vld [vmem:[%s4753_s8 + $0x18] sm:$0xff] }
 0x29b   : > { %v2360_v23 = vpop.f32.mrf.mxu0 }
 0x29c   : > { %v2365_v18 = vadd.f32 %v2360_v23, %v2275_v8 }
 0x29d   : > { %v2362_v20 = vpop.f32.mrf.mxu0 }
 0x29e   : > { %v2366_v24 = vadd.f32 %v2362_v20, %v2276_v32 }
 0x29f   : > { %v2450_v22 = vpop.f32.mrf.mxu1 }
 0x2a0   : > { %v2455_v25 = vadd.f32 %v2450_v22, %v2365_v18 }
 0x2a1   : > { %v2452_v30 = vpop.f32.mrf.mxu1 }
 0x2a2   : > { %v2462_v11 = vadd.f32 %v2460_v29, %v2455_v25  ;;  %v2456_v31 = vadd.f32 %v2452_v30, %v2366_v24  ;;  %v576_v24 = vld [vmem:[%s4753_s8 + $0x28] sm:$0xff] }
 0x2a4   : > { %v4565_v34 = vmax.f32 %v2462_v11, 0.0  ;;  %v2463_v35 = vadd.f32 %v2460_v29, %v2456_v31  ;;  %v577_v31 = vld [vmem:[%s4753_s8 + $0x30] sm:$0xff] }
 0x2a6   : > { %v4567_v36 = vmax.f32 %v2463_v35, 0.0  ;;  %2474 = vrot.lane.b32.xlu1 %v4565_v34, %s3984_s26 }
 0x2a8   : > { %2476 = vrot.lane.b32.xlu0 %v4567_v36, %s3984_s26 }
 0x2aa   : > { %2466 = vrot.lane.b32.xlu1 %v4565_v34, %s3983_s23 }
 0x2ac   : > { %2468 = vrot.lane.b32.xlu0 %v4567_v36, %s3983_s23 }
 0x2ae   : > { %2644 = vrot.lane.b32.xlu1 %v4565_v34, %s3985_s22 }
 0x2b0   : > { %2646 = vrot.lane.b32.xlu0 %v4567_v36, %s3985_s22  ;;  %s532_s22 = scalar_lea.vmem %s4759_s14, %s3747_s17 }
 0x2b2   : > { %2734 = vrot.lane.b32.xlu1 %v4565_v34, %s3986_s24 }
 0x2b4   : > { %2736 = vrot.lane.b32.xlu0 %v4567_v36, %s3986_s24 }
 0x2b6   : > { %2906 = vrot.lane.b32.xlu1 %v4565_v34, %s3987_s27 }
 0x2b8   : > { %2908 = vrot.lane.b32.xlu0 %v4567_v36, %s3987_s27 }
 0x2ba   : > { %2996 = vrot.lane.b32.xlu1 %v4565_v34, %s3988_s19 }
 0x2bc   : > { %2998 = vrot.lane.b32.xlu0 %v4567_v36, %s3988_s19 }
 0x2be   : > { %3086 = vrot.lane.b32.xlu1 %v4565_v34, %s3989_s28 }
 0x2c0   : > { %3088 = vrot.lane.b32.xlu0 %v4567_v36, %s3989_s28 }
 0x2c2   : > { %3176 = vrot.lane.b32.xlu1 %v4565_v34, %s3990_s30 }
 0x2c4   : > { %3178 = vrot.lane.b32.xlu0 %v4567_v36, %s3990_s30 }
 0x2c6   : > { %1652 = vperm.xlu1 %3821, %v560_v39   ;;  %v578_v39 = vld [vmem:[%s4753_s8 + $0x38] sm:$0xff] }
 0x2c8   : > { %3268 = vperm.xlu0 %3820, %v580_v43  }
 0x2ca   : > { %3512 = vperm.xlu1 %3821, %v584_v44  }
 0x318   : > { %v2475_v45 = vpop.permute.xlu1 %2474 }
 0x31a   : > { %v2477_v46 = vpop.permute.xlu0 %2476 }
 0x31b   : > { %v2478_v47 = vsel %vm731_vm2, %v2475_v45, %v2477_v46  ;;  %v2479_v16 = vsel %vm731_vm2, %v2477_v46, %v2475_v45 }
 0x31c   : > { %v2480_v51 = vmul.f32 %v2479_v16, %v4291_v41  ;;  %v2481_v14 = vmul.f32 %v2478_v47, %v4293_v42  ;;  %v2467_v52 = vpop.permute.xlu1 %2466  ;;  %v579_v47 = vld [vmem:[%s4753_s8 + $0x40] sm:$0xff] }
 0x31e   : > { %3711 = vmatprep.subr.msk.mxu0 %vm2486_vm10, %v2481_v14  ;;  %v2469_v54 = vpop.permute.xlu0 %2468  ;;  %v581_v14 = vld [vmem:[#allocation7] sm:$0xf] }
 0x31f   : > { %v2470_v56 = vsel %vm703_vm3, %v2467_v52, %v2469_v54  ;;  %v2471_v57 = vsel %vm703_vm3, %v2469_v54, %v2467_v52  ;;  %3712 = vmatpush1.msk.msra.mxu0 %vm2486_vm10, %v2480_v51 }
 0x320   : > { %v2472_v41 = vmul.f32 %v2471_v57, %v4301_v49  ;;  %v2473_v42 = vmul.f32 %v2470_v56, %v4303_v50  ;;  %v2645_v27 = vpop.permute.xlu1 %2644  ;;  %3713 = vmatmul.mubr.msk.f32.vlgmr.msra.gmra.mxu0 %vm2482_vm11, %v572_v53 }
 0x321   : > { %2725 = vmatprep.mubr.f32.mxu0 %v3981_v0 }
 0x322   : > { %3714 = vmatprep.subr.msk.mxu1 %vm2486_vm10, %v2473_v42  ;;  %v2647_v60 = vpop.permute.xlu0 %2646 }
 0x323   : > { %v2648_v63 = vsel %vm918_vm4, %v2645_v27, %v2647_v60  ;;  %v2649_v49 = vsel %vm918_vm4, %v2647_v60, %v2645_v27  ;;  %3715 = vmatpush1.msk.msra.mxu1 %vm2486_vm10, %v2472_v41 }
 0x324   : > { %v2650_v50 = vmul.f32 %v2649_v49, %v4310_v58  ;;  %v2651_v1 = vmul.f32 %v2648_v63, %v4323_v4  ;;  %v2735_v2 = vpop.permute.xlu1 %2734  ;;  %3716 = vmatmul.mubr.msk.f32.vlgmr.msra.gmra.mxu1 %vm2482_vm11, %v571_v59 }
 0x325   : > { %2815 = vmatprep.mubr.f32.mxu1 %v3981_v0 }
 0x326   : > { %3717 = vmatprep.subr.msk.mxu0 %vm2486_vm10, %v2651_v1  ;;  %v2737_v5 = vpop.permute.xlu0 %2736 }
 0x327   : > { %v2738_v6 = vsel %vm1028_vm5, %v2735_v2, %v2737_v5  ;;  %v2739_v58 = vsel %vm1028_vm5, %v2737_v5, %v2735_v2  ;;  %3718 = vmatpush1.msk.msra.mxu0 %vm2486_vm10, %v2650_v50 }
 0x328   : > { %v2740_v4 = vmul.f32 %v2739_v58, %v4330_v9  ;;  %v2741_v7 = vmul.f32 %v2738_v6, %v4345_v28  ;;  %v2907_v8 = vpop.permute.xlu1 %2906  ;;  %3723 = vmatprep.subr.msk.mxu0 %vm2486_vm10, %v4567_v36  ;;  %3719 = vmatmul.mubr.msk.f32.vlgmr.msra.gmra.mxu0 %vm2482_vm11, %v573_v3  ;;  %v575_v9 = vld [vmem:[%s4753_s8 + $0x20] sm:$0xff] }
 0x329   : > { %3724 = vmatpush1.msk.msra.mxu0 %vm2486_vm10, %v4565_v34  ;;  %2897 = vmatprep.mubr.f32.mxu0 %v3981_v0 }
 0x32a   : > { %3720 = vmatprep.subr.msk.mxu1 %vm2486_vm10, %v2741_v7  ;;  %v2909_v28 = vpop.permute.xlu0 %2908 }
 0x32b   : > { %v2910_v23 = vsel %vm1217_vm6, %v2907_v8, %v2909_v28  ;;  %v2911_v20 = vsel %vm1217_vm6, %v2909_v28, %v2907_v8  ;;  %3721 = vmatpush1.msk.msra.mxu1 %vm2486_vm10, %v2740_v4 }
 0x32c   : > { %v2912_v32 = vmul.f32 %v2910_v23, %v4359_v38  ;;  %v2913_v18 = vmul.f32 %v2911_v20, %v4361_v26  ;;  %v2997_v22 = vpop.permute.xlu1 %2996  ;;  %3722 = vmatmul.mubr.msk.f32.vlgmr.msra.gmra.mxu1 %vm2482_vm11, %v574_v17  ;;  %3725 = vmatmul.mubr.msk.f32.vlgmr.msra.gmra.mxu0 %vm2482_vm11, %v575_v9 }
 0x32d   : > { %2987 = vmatprep.mubr.f32.mxu1 %v3981_v0  ;;  %3077 = vmatprep.mubr.f32.mxu0 %v3981_v0 }
 0x32e   : > { %3726 = vmatprep.subr.msk.mxu1 %vm2486_vm10, %v2913_v18  ;;  %v2999_v25 = vpop.permute.xlu0 %2998 }
 0x32f   : > { %v3000_v38 = vsel %vm1326_vm7, %v2997_v22, %v2999_v25  ;;  %v3001_v26 = vsel %vm1326_vm7, %v2999_v25, %v2997_v22  ;;  %3727 = vmatpush1.msk.msra.mxu1 %vm2486_vm10, %v2912_v32 }
 0x330   : > { %v3002_v29 = vmul.f32 %v3000_v38, %v4375_v48  ;;  %v3003_v30 = vmul.f32 %v3001_v26, %v4390_v55  ;;  %v3087_v11 = vpop.permute.xlu1 %3086  ;;  %3728 = vmatmul.mubr.msk.f32.vlgmr.msra.gmra.mxu1 %vm2482_vm11, %v576_v24  ;;  %v583_v26 = vld [vmem:[%s4757_s12] sm:$0xf] }
 0x331   : > { %3167 = vmatprep.mubr.f32.mxu1 %v3981_v0 }
 0x332   : > { %3729 = vmatprep.subr.msk.mxu0 %vm2486_vm10, %v3003_v30  ;;  %v3089_v34 = vpop.permute.xlu0 %3088 }
 0x333   : > { %v3090_v35 = vsel %vm1436_vm8, %v3087_v11, %v3089_v34  ;;  %v3091_v48 = vsel %vm1436_vm8, %v3089_v34, %v3087_v11  ;;  %3730 = vmatpush1.msk.msra.mxu0 %vm2486_vm10, %v3002_v29 }
 0x334   : > { %v3092_v55 = vmul.f32 %v3090_v35, %v4404_v61  ;;  %v3093_v36 = vmul.f32 %v3091_v48, %v4407_v62  ;;  %3731 = vmatmul.mubr.msk.f32.vlgmr.msra.gmra.mxu0 %vm2482_vm11, %v577_v31  ;;  %v3177_v43 = vpop.permute.xlu1 %3176 }
 0x335   : > { %3257 = vmatprep.mubr.f32.mxu0 %v3981_v0 }
 0x336   : > { %3732 = vmatprep.subr.msk.mxu1 %vm2486_vm10, %v3093_v36  ;;  %v3179_v44 = vpop.permute.xlu0 %3178 }
 0x337   : > { %v3180_v45 = vsel %vm1545_vm9, %v3177_v43, %v3179_v44  ;;  %v3181_v61 = vsel %vm1545_vm9, %v3179_v44, %v3177_v43  ;;  %3733 = vmatpush1.msk.msra.mxu1 %vm2486_vm10, %v3092_v55 }
 0x338   : > { %v3182_v62 = vmul.f32 %v3180_v45, %v4427_v19  ;;  %v3183_v46 = vmul.f32 %v3181_v61, %v4430_v21  ;;  %3734 = vmatmul.mubr.msk.f32.vlgmr.msra.gmra.mxu1 %vm2482_vm11, %v578_v39 }
 0x339   : > { %3348 = vmatprep.mubr.f32.mxu1 %v3981_v0 }
 0x33a   : > { %3735 = vmatprep.subr.msk.mxu0 %vm2486_vm10, %v3183_v46 }
 0x33b   : > { %3736 = vmatpush1.msk.msra.mxu0 %vm2486_vm10, %v3182_v62 }
 0x33c   : > { %3737 = vmatmul.mubr.msk.f32.vlgmr.msra.gmra.mxu0 %vm2482_vm11, %v579_v47  ;;  %3741 = vmatprep.subr.msk.mxu0 %vm605_vm0, %v688_v15  ;;  %v3823_v47 = vld [vmem:[%s4166_s25] sm:$0xff] }
 0x33d   : > { %3742 = vmatpush1.msk.msra.mxu0 %vm605_vm0, %v687_v12  ;;  %3426 = vmatprep.mubr.f32.mxu0 %v3981_v0 }
 0x340   : > { %3743 = vmatmul.mubr.msk.f32.vlgmr.msra.gmra.mxu0 %vm598_vm1, %v581_v14 }
 0x341   : > { %v1653_v33 = vpop.permute.xlu1 %1652 }
 0x342   : > { %v1655_v19 = vadd.f32 %v1653_v33, %v4561_v37  ;;  %v1656_v21 = vadd.f32 %v1653_v33, %v4563_v40 }
 0x343   : > { %v3269_v32 = vpop.permute.xlu0 %3268 }
 0x344   : > { %v1657_v16 = vmax.f32 %v1655_v19, 0.0  ;;  %v1658_v51 = vmax.f32 %v1656_v21, 0.0 }
 0x345   : > { %v3513_v36 = vpop.permute.xlu1 %3512 }
 0x346   : > { %3738 = vmatprep.subr.msk.mxu1 %vm2486_vm10, %v1658_v51 }
 0x347   : > { %3739 = vmatpush1.msk.msra.mxu1 %vm2486_vm10, %v1657_v16 }
 0x348   : > { %3740 = vmatmul.mubr.msk.f32.vlgmr.msra.gmra.mxu1 %vm2482_vm11, %v582_v13 }
 0x349   : > { %3501 = vmatprep.mubr.f32.mxu1 %v3981_v0 }
 0x3e0   : > { %v2559_v10 = vpop.f32.mrf.mxu0 }
 0x3e2   : > { %v2561_v12 = vpop.f32.mrf.mxu0 }
 0x3e4   : > { %v2639_v15 = vpop.f32.mrf.mxu1 }
 0x3e5   : > { %v2640_v37 = vadd.f32 %v2639_v15, %v2559_v10 }
 0x3e6   : > { %v2641_v52 = vpop.f32.mrf.mxu1 }
 0x3e7   : > { %v2642_v40 = vadd.f32 %v2641_v52, %v2561_v12 }
 0x3e8   : > { %v2727_v53 = vpop.f32.mrf.mxu0 }
 0x3e9   : > { %v2732_v54 = vadd.f32 %v2727_v53, %v2640_v37 }
 0x3ea   : > { %v2729_v56 = vpop.f32.mrf.mxu0 }
 0x3eb   : > { %v2733_v57 = vadd.f32 %v2729_v56, %v2642_v40 }
 0x3ec   : > { %v2817_v41 = vpop.f32.mrf.mxu1  ;;  %v2899_v42 = vpop.f32.mrf.mxu0 }
 0x3ed   : > { %v2822_v27 = vadd.f32 %v2817_v41, %v2732_v54 }
 0x3ee   : > { %v2819_v59 = vpop.f32.mrf.mxu1  ;;  %v2901_v49 = vpop.f32.mrf.mxu0 }
 0x3ef   : > { %v2823_v60 = vadd.f32 %v2819_v59, %v2733_v57  ;;  %v2904_v63 = vadd.f32 %v2899_v42, %v2822_v27 }
 0x3f0   : > { %v2989_v50 = vpop.f32.mrf.mxu1 }
 0x3f1   : > { %v2905_v1 = vadd.f32 %v2901_v49, %v2823_v60  ;;  %v2994_v0 = vadd.f32 %v2989_v50, %v2904_v63 }
 0x3f2   : > { %v2991_v2 = vpop.f32.mrf.mxu1 }
 0x3f3   : > { %v2995_v5 = vadd.f32 %v2991_v2, %v2905_v1 }
 0x3f4   : > { %v3079_v3 = vpop.f32.mrf.mxu0 }
 0x3f5   : > { %v3084_v6 = vadd.f32 %v3079_v3, %v2994_v0 }
 0x3f6   : > { %v3081_v58 = vpop.f32.mrf.mxu0 }
 0x3f7   : > { %v3085_v8 = vadd.f32 %v3081_v58, %v2995_v5 }
 0x3f8   : > { %v3169_v4 = vpop.f32.mrf.mxu1 }
 0x3f9   : > { %v3174_v17 = vadd.f32 %v3169_v4, %v3084_v6 }
 0x3fa   : > { %v3171_v7 = vpop.f32.mrf.mxu1 }
 0x3fb   : > { %v3175_v28 = vadd.f32 %v3171_v7, %v3085_v8 }
 0x3fc   : > { %v3259_v9 = vpop.f32.mrf.mxu0 }
 0x3fd   : > { %v3264_v23 = vadd.f32 %v3259_v9, %v3174_v17 }
 0x3fe   : > { %v3261_v20 = vpop.f32.mrf.mxu0 }
 0x3ff   : > { %v3265_v18 = vadd.f32 %v3261_v20, %v3175_v28  ;;  %v3271_v22 = vadd.f32 %v3269_v32, %v3264_v23 }
 0x400   : > { %v3428_v30 = vpop.f32.mrf.mxu0 }
 0x401   : > { %v3272_v24 = vadd.f32 %v3269_v32, %v3265_v18  ;;  %v3273_v38 = vmax.f32 %v3271_v22, 0.0 }
 0x402   : > { %v3430_v31 = vpop.f32.mrf.mxu0 }
 0x403   : > { %v3274_v25 = vmax.f32 %v3272_v24, 0.0 }
 0x405   : > { %3467 = vmatprep.subr.mxu1 %v3274_v25 }
 0x406   : > { %3468 = vmatpush1.msra.mxu1 %v3273_v38 }
 0x407   : > { %3744 = vmatmul.mubr.msk.f32.vlgmr.msra.gmra.mxu1 %vm3433_vm12, %v583_v26 }
 0x408   : > { %v3350_v29 = vpop.f32.mrf.mxu1 }
 0x409   : > { %v3429_v34 = vadd.f32 %v3428_v30, %v3350_v29 }
 0x40a   : > { %v3352_v11 = vpop.f32.mrf.mxu1 }
 0x40b   : > { %v3431_v48 = vadd.f32 %v3430_v31, %v3352_v11 }
 0x4c7   : > { %v3503_v35 = vpop.f32.mrf.mxu1 }
 0x4c8   : > { %v3508_v55 = vadd.f32 %v3503_v35, %v3429_v34 }
 0x4c9   : > { %v3505_v39 = vpop.f32.mrf.mxu1 }
 0x4ca   : > { %v3515_v43 = vadd.f32 %v3513_v36, %v3508_v55  ;;  %v3509_v44 = vadd.f32 %v3505_v39, %v3431_v48 }
 0x4cc   : > { %v3516_v45 = vadd.f32 %v3513_v36, %v3509_v44  ;;  %v3517_v61 = vmax.f32 %v3515_v43, 0.0 }
 0x4ce   : > { %v3518_v62 = vmax.f32 %v3516_v45, 0.0 }
 0x4d0   : > { %v3521_v46 = vcombine.low %v3517_v61, %v3518_v62 }
 0x4d2   : > { %v3523_v33 = vadd.f32 %v3823_v47, %v3521_v46 }
 0x4d4   : > { %v3524_v19 = vmax.f32 %v3523_v33, 0.0 }
 0x4d6   : > { %3525 = vst [vmem:[%s532_s22] sm:$0xff] %v3524_v19 }
 0x4d7 PF: > { %s27_s29 = sadd.s32 1, %s3972_s29  }
 0x4d8   : > { %p24_p12 = scmp.ge.s32.totalorder %s27_s29, 4  }
 0x4da   :  { %26 = sbr.rel (!%p24_p12) target bundleno = 3 (0x3), region = 127 }
 0x4df   :  { %3547 = vsyncpa [#allocation3], 1 }
 0x4e0   :  { %3549 = vsyncpa [#allocation3 + $0x1], 1 }
 0x4e1   :  { %3550 = vsyncpa [#allocation5], 1 }
 0x4e2   :  { %3551 = vsyncpa [#allocation8], 1 }

</bundles_post_ra>
